<compile_context>
chip_gen: v6e
topology: v6e:2x2x1
jax: 0.10.0
libtpu: 0.0.40
codegen_flags: <defaults>
</compile_context>

<pallas_src>
import jax
import jax.numpy as jnp
from jax.experimental import pallas as pl
from jax.experimental.pallas import tpu as pltpu

BN_EPS = 1e-5
# Matmul operand dtype.  jnp.bfloat16 ~doubles MXU throughput and halves
# patch/weight VMEM, but drifts ~1e-2 max-abs from the f32 PyTorch reference;
# keep f32 so the strict 1e-3 parity check below stays meaningful.
MATMUL_DTYPE = jnp.float32
VMEM_LIMIT_BYTES = 32 * 1024 * 1024   # explicit scoped-VMEM limit (safe on v5e/v6e/v7x)


def _conv3x3_im2col(pad_ref, patch_ref, interior, w_ref):
    """3x3 'same' conv of `interior` (H, W, C) as ONE deep-K matmul.

    pad_ref   : VMEM (H+2, W+2, C) f32  halo buffer (only the halo is zeroed)
    patch_ref : VMEM (H*W, 9*C)         im2col matrix (MATMUL_DTYPE)
    w_ref     : (9*C, Co)               weights, tap-major (dy, dx, c) rows
    returns   : (H*W, Co) f32 accumulator
    """
    hp, wp, c = interior.shape
    # Zero only the 1-pixel halo; the interior is written exactly once below.
    zrow = jnp.zeros((1, wp + 2, c), jnp.float32)
    zcol = jnp.zeros((hp, 1, c), jnp.float32)
    pad_ref[0:1, :, :] = zrow
    pad_ref[hp + 1:hp + 2, :, :] = zrow
    pad_ref[1:hp + 1, 0:1, :] = zcol
    pad_ref[1:hp + 1, wp + 1:wp + 2, :] = zcol
    pad_ref[1:hp + 1, 1:wp + 1, :] = interior
    # im2col: lay the 9 taps side-by-side on the lane dim, then a single
    # (H*W, 9C) @ (9C, Co) matmul (deep contraction -> much better MXU fill
    # than 9 separate C-deep matmuls, especially for tiny C).
    for dy in range(3):
        for dx in range(3):
            tap = dy * 3 + dx
            patch_ref[:, tap * c:(tap + 1) * c] = (
                pad_ref[dy:dy + hp, dx:dx + wp, :]
                .reshape(hp * wp, c).astype(patch_ref.dtype))
    return jnp.dot(patch_ref[...], w_ref[...],
                   preferred_element_type=jnp.float32)


def _store_stats(s_ref, acc):
    # One-pass per-channel partial stats (sum, sum of squares) for BatchNorm.
    s_ref[0, 0:1, :] = jnp.sum(acc, axis=0, keepdims=True)
    s_ref[0, 1:2, :] = jnp.sum(acc * acc, axis=0, keepdims=True)


def _pool_conv1_kernel(x_ref, w1_ref, y1_ref, s1_ref, pad_ref, patch_ref):
    # x_ref : (1, HP, 2, WP, 2*Cin)  one image, pooling window split over an
    #         outer dim (row parity) and the lane dim (column parity).
    # y1_ref: (1, HP, WP, Cmid)      pre-BN conv1 output
    # s1_ref: (1, 2, Cmid)           per-image [sum, sum_sq] of conv1 output
    hp, wp, cmid = y1_ref.shape[1], y1_ref.shape[2], y1_ref.shape[3]
    cin = x_ref.shape[-1] // 2
    # ---- MaxPool2d(2), fully in-kernel from one contiguous DMA ----
    rmax = jnp.maximum(x_ref[0, :, 0, :, :], x_ref[0, :, 1, :, :])  # (HP, WP, 2*Cin)
    p = jnp.maximum(rmax[:, :, :cin], rmax[:, :, cin:])             # (HP, WP, Cin)
    # ---- Conv1 (bias dropped: exactly cancelled by BN mean subtraction) ----
    acc = _conv3x3_im2col(pad_ref, patch_ref, p.astype(jnp.float32), w1_ref)
    y1_ref[0] = acc.reshape(hp, wp, cmid)
    _store_stats(s1_ref, acc)


def _bn1_conv2_kernel(y1_ref, sc1_ref, sh1_ref, w2_ref, y2_ref, s2_ref,
                      pad_ref, patch_ref):
    hp, wp = y1_ref.shape[1], y1_ref.shape[2]
    cout = y2_ref.shape[3]
    # BN1 (pre-folded scale/shift) + ReLU, written straight into the conv2
    # halo buffer interior (no separate h1 materialisation / re-store).
    h = jnp.maximum(y1_ref[0] * sc1_ref[...] + sh1_ref[...], 0.0)
    acc = _conv3x3_im2col(pad_ref, patch_ref, h, w2_ref)
    y2_ref[0] = acc.reshape(hp, wp, cout)
    _store_stats(s2_ref, acc)


def _bn2_relu_kernel(y2_ref, sc2_ref, sh2_ref, o_ref):
    o_ref[0] = jnp.maximum(y2_ref[0] * sc2_ref[...] + sh2_ref[...],
                           0.0).astype(o_ref.dtype)


def _bn_scale_shift(stats, gamma, beta, count):
    """Finish BN statistics (tiny (C,)-sized math, done in plain JAX)."""
    ssum = jnp.sum(stats[:, 0, :], axis=0)
    ssq = jnp.sum(stats[:, 1, :], axis=0)
    mean = ssum / count
    var = jnp.maximum(ssq / count - mean * mean, 0.0)    # biased variance
    scale = gamma * jax.lax.rsqrt(var + BN_EPS)
    shift = beta - mean * scale
    c = scale.shape[0]
    return scale.reshape(1, c), shift.reshape(1, c)


def down_forward(x_nchw, kparams):
    """Pallas implementation of Down.forward. x_nchw: (N, Cin, H, W) f32."""
    n, cin, h, w = x_nchw.shape
    hp, wp = h // 2, w // 2
    w1 = kparams["w1"].astype(MATMUL_DTYPE)      # (9*Cin, Cmid)
    w2 = kparams["w2"].astype(MATMUL_DTYPE)      # (9*Cmid, Cout)
    cmid, cout = w1.shape[-1], w2.shape[-1]

    # Layout glue (free, contiguous reshapes only — no strided HBM copies).
    x = jnp.transpose(x_nchw, (0, 2, 3, 1))              # NHWC
    x = x.reshape(n, hp, 2, wp, 2 * cin)                 # pooling-window split

    cp = pltpu.CompilerParams(dimension_semantics=("parallel",),
                              vmem_limit_bytes=VMEM_LIMIT_BYTES)
    full2 = lambda shape: pl.BlockSpec(shape, lambda i: (0, 0))

    # ---- Pass 1: maxpool + conv1, plus per-image BN1 partial statistics ----
    # TODO(synk): for large H*W, additionally tile each image over row blocks
    # with a 1-row halo (here one image per grid step is assumed to fit VMEM).
    y1, s1 = pl.pallas_call(
        _pool_conv1_kernel,
        grid=(n,),
        in_specs=[pl.BlockSpec((1, hp, 2, wp, 2 * cin),
                               lambda i: (i, 0, 0, 0, 0)),
                  full2((9 * cin, cmid))],
        out_specs=[pl.BlockSpec((1, hp, wp, cmid), lambda i: (i, 0, 0, 0)),
                   pl.BlockSpec((1, 2, cmid), lambda i: (i, 0, 0))],
        out_shape=[jax.ShapeDtypeStruct((n, hp, wp, cmid), jnp.float32),
                   jax.ShapeDtypeStruct((n, 2, cmid), jnp.float32)],
        scratch_shapes=[pltpu.VMEM((hp + 2, wp + 2, cin), jnp.float32),
                        pltpu.VMEM((hp * wp, 9 * cin), MATMUL_DTYPE)],
        compiler_params=cp,
    )(x, w1)

    sc1, sh1 = _bn_scale_shift(s1, kparams["g1"], kparams["be1"], n * hp * wp)

    # ---- Pass 2: BN1-apply + ReLU + conv2, plus BN2 partial statistics ----
    y2, s2 = pl.pallas_call(
        _bn1_conv2_kernel,
        grid=(n,),
        in_specs=[pl.BlockSpec((1, hp, wp, cmid), lambda i: (i, 0, 0, 0)),
                  full2((1, cmid)), full2((1, cmid)),
                  full2((9 * cmid, cout))],
        out_specs=[pl.BlockSpec((1, hp, wp, cout), lambda i: (i, 0, 0, 0)),
                   pl.BlockSpec((1, 2, cout), lambda i: (i, 0, 0))],
        out_shape=[jax.ShapeDtypeStruct((n, hp, wp, cout), jnp.float32),
                   jax.ShapeDtypeStruct((n, 2, cout), jnp.float32)],
        scratch_shapes=[pltpu.VMEM((hp + 2, wp + 2, cmid), jnp.float32),
                        pltpu.VMEM((hp * wp, 9 * cmid), MATMUL_DTYPE)],
        compiler_params=cp,
    )(y1, sc1, sh1, w2)

    sc2, sh2 = _bn_scale_shift(s2, kparams["g2"], kparams["be2"], n * hp * wp)

    # ---- Pass 3: BN2-apply + ReLU ----
    out_nhwc = pl.pallas_call(
        _bn2_relu_kernel,
        grid=(n,),
        in_specs=[pl.BlockSpec((1, hp, wp, cout), lambda i: (i, 0, 0, 0)),
                  full2((1, cout)), full2((1, cout))],
        out_specs=pl.BlockSpec((1, hp, wp, cout), lambda i: (i, 0, 0, 0)),
        out_shape=jax.ShapeDtypeStruct((n, hp, wp, cout), jnp.float32),
        compiler_params=cp,
    )(y2, sc2, sh2)

    return jnp.transpose(out_nhwc, (0, 3, 1, 2))         # back to NCHW


def init_params(key, cin, cout):
    """Deterministic synthetic parameters (PyTorch shapes + kernel-format)."""
    cmid = cout
    ks = jax.random.split(key, 8)
    w1_pt = 0.1 * jax.random.normal(ks[0], (cmid, cin, 3, 3), jnp.float32)
    b1 = 0.1 * jax.random.normal(ks[1], (cmid,), jnp.float32)
    g1 = 1.0 + 0.1 * jax.random.normal(ks[2], (cmid,), jnp.float32)
    be1 = 0.1 * jax.random.normal(ks[3], (cmid,), jnp.float32)
    w2_pt = 0.1 * jax.random.normal(ks[4], (cout, cmid, 3, 3), jnp.float32)
    b2 = 0.1 * jax.random.normal(ks[5], (cout,), jnp.float32)
    g2 = 1.0 + 0.1 * jax.random.normal(ks[6], (cout,), jnp.float32)
    be2 = 0.1 * jax.random.normal(ks[7], (cout,), jnp.float32)

    pt = dict(w1=w1_pt, b1=b1, g1=g1, be1=be1, w2=w2_pt, b2=b2, g2=g2, be2=be2)
    # Kernel format: weights (9*Cin, Cout), tap-major (dy, dx, ci) rows.
    # Conv biases are intentionally absent from the kernel params: with
    # training-mode BatchNorm right after each conv they are cancelled exactly
    # by the batch-mean subtraction.
    kfmt = dict(
        w1=jnp.transpose(w1_pt, (2, 3, 1, 0)).reshape(9 * cin, cmid),
        w2=jnp.transpose(w2_pt, (2, 3, 1, 0)).reshape(9 * cmid, cout),
        g1=g1, be1=be1, g2=g2, be2=be2,
    )
    return pt, kfmt


def down_reference(x, p):
    """Pure-JAX (NCHW) reference matching the PyTorch module."""
    def conv(z, w, b):
        y = jax.lax.conv_general_dilated(
            z, w, (1, 1), ((1, 1), (1, 1)),
            dimension_numbers=("NCHW", "OIHW", "NCHW"),
            precision=jax.lax.Precision.HIGHEST)
        return y + b[None, :, None, None]

    def bn_relu(y, g, be):
        mean = jnp.mean(y, axis=(0, 2, 3), keepdims=True)
        var = jnp.mean((y - mean) ** 2, axis=(0, 2, 3), keepdims=True)
        yn = (y - mean) / jnp.sqrt(var + BN_EPS)
        return jnp.maximum(yn * g[None, :, None, None] + be[None, :, None, None], 0.0)

    xp = jax.lax.reduce_window(x, -jnp.inf, jax.lax.max,
                               (1, 1, 2, 2), (1, 1, 2, 2), "VALID")
    h = bn_relu(conv(xp, p["w1"], p["b1"]), p["g1"], p["be1"])
    h = bn_relu(conv(h, p["w2"], p["b2"]), p["g2"], p["be2"])
    return h


if __name__ == "__main__":
    key = jax.random.PRNGKey(0)
    kx, kp = jax.random.split(key)

    N, Cin, H, W = 2, 4, 16, 16
    Cout = 8
    x = jax.random.normal(kx, (N, Cin, H, W), jnp.float32)
    params_pt, params_k = init_params(kp, Cin, Cout)

    out = jax.jit(down_forward)(x, params_k)
    out = jax.block_until_ready(out)
    assert out.shape == (N, Cout, H // 2, W // 2)

    ref = down_reference(x, params_pt)
    max_err = float(jnp.max(jnp.abs(out - ref)))
    if not (max_err < 1e-3):
        raise AssertionError(f"kernel/reference mismatch: max abs err = {max_err}")

    print("KERNEL_OK")
</pallas_src>

<mosaic_0001>
module attributes {stable_mosaic.version = 11 : i64} {
  func.func @_bn2_relu_kernel(%arg0: i32, %arg1: memref<1x8x8x8xf32, #tpu.memory_space<vmem>>, %arg2: memref<1x8xf32, #tpu.memory_space<vmem>>, %arg3: memref<1x8xf32, #tpu.memory_space<vmem>>, %arg4: memref<1x8x8x8xf32, #tpu.memory_space<vmem>>) attributes {dimension_semantics = [#tpu.dimension_semantics<parallel>], iteration_bounds = array<i64: 2>, scalar_prefetch = 0 : i64, scratch_operands = 0 : i64, tpu.core_type = #tpu.core_type<tc>, window_params = [{transform_indices = @transform_0, window_bounds = array<i64: 1, 8, 8, 8>}, {pipeline_mode = #tpu.pipeline_mode<synchronous>, transform_indices = @transform_1, window_bounds = array<i64: 1, 8>}, {pipeline_mode = #tpu.pipeline_mode<synchronous>, transform_indices = @transform_2, window_bounds = array<i64: 1, 8>}, {transform_indices = @transform_3, window_bounds = array<i64: 1, 8, 8, 8>}]} {
    %c0 = arith.constant 0 : index
    %c0_0 = arith.constant 0 : index
    %c0_1 = arith.constant 0 : index
    %c0_2 = arith.constant 0 : index
    %0 = vector.load %arg1[%c0, %c0_0, %c0_1, %c0_2] : memref<1x8x8x8xf32, #tpu.memory_space<vmem>>, vector<1x8x8x8xf32>
    %1 = vector.shape_cast %0 : vector<1x8x8x8xf32> to vector<8x8x8xf32>
    %c0_3 = arith.constant 0 : index
    %c0_4 = arith.constant 0 : index
    %2 = vector.load %arg2[%c0_3, %c0_4] : memref<1x8xf32, #tpu.memory_space<vmem>>, vector<1x8xf32>
    %3 = vector.shape_cast %2 : vector<1x8xf32> to vector<1x1x8xf32>
    %4 = vector.broadcast %3 : vector<1x1x8xf32> to vector<8x8x8xf32>
    %5 = arith.mulf %1, %4 : vector<8x8x8xf32>
    %c0_5 = arith.constant 0 : index
    %c0_6 = arith.constant 0 : index
    %6 = vector.load %arg3[%c0_5, %c0_6] : memref<1x8xf32, #tpu.memory_space<vmem>>, vector<1x8xf32>
    %7 = vector.shape_cast %6 : vector<1x8xf32> to vector<1x1x8xf32>
    %8 = vector.broadcast %7 : vector<1x1x8xf32> to vector<8x8x8xf32>
    %9 = arith.addf %5, %8 : vector<8x8x8xf32>
    %cst = arith.constant 0.000000e+00 : f32
    %10 = vector.broadcast %cst : f32 to vector<8x8x8xf32>
    %11 = arith.maximumf %9, %10 : vector<8x8x8xf32>
    %c0_7 = arith.constant 0 : index
    %c0_8 = arith.constant 0 : index
    %c0_9 = arith.constant 0 : index
    %c0_10 = arith.constant 0 : index
    %12 = vector.load %arg4[%c0_7, %c0_8, %c0_9, %c0_10] : memref<1x8x8x8xf32, #tpu.memory_space<vmem>>, vector<1x8x8x8xf32>
    %13 = vector.shape_cast %12 : vector<1x8x8x8xf32> to vector<8x8x8xf32>
    %14 = vector.shape_cast %11 : vector<8x8x8xf32> to vector<1x8x8x8xf32>
    tpu.vector_store %arg4[%c0_7, %c0_8, %c0_9, %c0_10], %14 {strides = array<i32>} : memref<1x8x8x8xf32, #tpu.memory_space<vmem>>, vector<1x8x8x8xf32>,
    return
  }
  func.func @transform_0(%arg0: i32) -> (i32, i32, i32, i32) {
    %c0_i32 = arith.constant 0 : i32
    %c0_i32_0 = arith.constant 0 : i32
    %c0_i32_1 = arith.constant 0 : i32
    %c0_i32_2 = arith.constant 0 : i32
    return %arg0, %c0_i32, %c0_i32_0, %c0_i32_1 : i32, i32, i32, i32
  }
  func.func @transform_1(%arg0: i32) -> (i32, i32) {
    %c0_i32 = arith.constant 0 : i32
    %c0_i32_0 = arith.constant 0 : i32
    %c0_i32_1 = arith.constant 0 : i32
    return %c0_i32, %c0_i32_0 : i32, i32
  }
  func.func @transform_2(%arg0: i32) -> (i32, i32) {
    %c0_i32 = arith.constant 0 : i32
    %c0_i32_0 = arith.constant 0 : i32
    %c0_i32_1 = arith.constant 0 : i32
    return %c0_i32, %c0_i32_0 : i32, i32
  }
  func.func @transform_3(%arg0: i32) -> (i32, i32, i32, i32) {
    %c0_i32 = arith.constant 0 : i32
    %c0_i32_0 = arith.constant 0 : i32
    %c0_i32_1 = arith.constant 0 : i32
    %c0_i32_2 = arith.constant 0 : i32
    return %arg0, %c0_i32, %c0_i32_0, %c0_i32_1 : i32, i32, i32, i32
  }
}

module attributes {stable_mosaic.version = 11 : i64} {
  func.func @_pool_conv1_kernel(%arg0: i32, %arg1: memref<1x8x2x8x8xf32, #tpu.memory_space<vmem>>, %arg2: memref<36x8xf32, #tpu.memory_space<vmem>>, %arg3: memref<1x8x8x8xf32, #tpu.memory_space<vmem>>, %arg4: memref<1x2x8xf32, #tpu.memory_space<vmem>>, %arg5: memref<10x10x4xf32, #tpu.memory_space<vmem>>, %arg6: memref<64x36xf32, #tpu.memory_space<vmem>>) attributes {dimension_semantics = [#tpu.dimension_semantics<parallel>], iteration_bounds = array<i64: 2>, scalar_prefetch = 0 : i64, scratch_operands = 2 : i64, tpu.core_type = #tpu.core_type<tc>, window_params = [{transform_indices = @transform_0, window_bounds = array<i64: 1, 8, 2, 8, 8>}, {pipeline_mode = #tpu.pipeline_mode<synchronous>, transform_indices = @transform_1, window_bounds = array<i64: 36, 8>}, {transform_indices = @transform_2, window_bounds = array<i64: 1, 8, 8, 8>}, {transform_indices = @transform_3, window_bounds = array<i64: 1, 2, 8>}]} {
    %c0 = arith.constant 0 : index
    %c0_0 = arith.constant 0 : index
    %c0_1 = arith.constant 0 : index
    %c0_2 = arith.constant 0 : index
    %c0_3 = arith.constant 0 : index
    %0 = vector.load %arg1[%c0, %c0_0, %c0_1, %c0_2, %c0_3] : memref<1x8x2x8x8xf32, #tpu.memory_space<vmem>>, vector<1x8x1x8x8xf32>
    %1 = vector.shape_cast %0 : vector<1x8x1x8x8xf32> to vector<8x8x8xf32>
    %c0_4 = arith.constant 0 : index
    %c0_5 = arith.constant 0 : index
    %c1 = arith.constant 1 : index
    %c0_6 = arith.constant 0 : index
    %c0_7 = arith.constant 0 : index
    %2 = vector.load %arg1[%c0_4, %c0_5, %c1, %c0_6, %c0_7] : memref<1x8x2x8x8xf32, #tpu.memory_space<vmem>>, vector<1x8x1x8x8xf32>
    %3 = vector.shape_cast %2 : vector<1x8x1x8x8xf32> to vector<8x8x8xf32>
    %4 = arith.maximumf %1, %3 : vector<8x8x8xf32>
    %5 = vector.extract_strided_slice %4 {offsets = [0, 0, 0], sizes = [8, 8, 4], strides = [1, 1, 1]} : vector<8x8x8xf32> to vector<8x8x4xf32>
    %6 = vector.extract_strided_slice %4 {offsets = [0, 0, 4], sizes = [8, 8, 4], strides = [1, 1, 1]} : vector<8x8x8xf32> to vector<8x8x4xf32>
    %7 = arith.maximumf %5, %6 : vector<8x8x4xf32>
    %cst = arith.constant 0.000000e+00 : f32
    %8 = vector.broadcast %cst : f32 to vector<1x10x4xf32>
    %cst_8 = arith.constant 0.000000e+00 : f32
    %9 = vector.broadcast %cst_8 : f32 to vector<8x1x4xf32>
    %c0_9 = arith.constant 0 : index
    %c0_10 = arith.constant 0 : index
    %c0_11 = arith.constant 0 : index
    %10 = vector.load %arg5[%c0_9, %c0_10, %c0_11] : memref<10x10x4xf32, #tpu.memory_space<vmem>>, vector<1x10x4xf32>
    tpu.vector_store %arg5[%c0_9, %c0_10, %c0_11], %8 {strides = array<i32>} : memref<10x10x4xf32, #tpu.memory_space<vmem>>, vector<1x10x4xf32>,
    %c9 = arith.constant 9 : index
    %c0_12 = arith.constant 0 : index
    %c0_13 = arith.constant 0 : index
    %11 = vector.load %arg5[%c9, %c0_12, %c0_13] : memref<10x10x4xf32, #tpu.memory_space<vmem>>, vector<1x10x4xf32>
    tpu.vector_store %arg5[%c9, %c0_12, %c0_13], %8 {strides = array<i32>} : memref<10x10x4xf32, #tpu.memory_space<vmem>>, vector<1x10x4xf32>,
    %c1_14 = arith.constant 1 : index
    %c0_15 = arith.constant 0 : index
    %c0_16 = arith.constant 0 : index
    %12 = vector.load %arg5[%c1_14, %c0_15, %c0_16] : memref<10x10x4xf32, #tpu.memory_space<vmem>>, vector<8x1x4xf32>
    tpu.vector_store %arg5[%c1_14, %c0_15, %c0_16], %9 {strides = array<i32>} : memref<10x10x4xf32, #tpu.memory_space<vmem>>, vector<8x1x4xf32>,
    %c1_17 = arith.constant 1 : index
    %c9_18 = arith.constant 9 : index
    %c0_19 = arith.constant 0 : index
    %13 = vector.load %arg5[%c1_17, %c9_18, %c0_19] : memref<10x10x4xf32, #tpu.memory_space<vmem>>, vector<8x1x4xf32>
    tpu.vector_store %arg5[%c1_17, %c9_18, %c0_19], %9 {strides = array<i32>} : memref<10x10x4xf32, #tpu.memory_space<vmem>>, vector<8x1x4xf32>,
    %c1_20 = arith.constant 1 : index
    %c1_21 = arith.constant 1 : index
    %c0_22 = arith.constant 0 : index
    %14 = vector.load %arg5[%c1_20, %c1_21, %c0_22] : memref<10x10x4xf32, #tpu.memory_space<vmem>>, vector<8x8x4xf32>
    tpu.vector_store %arg5[%c1_20, %c1_21, %c0_22], %7 {strides = array<i32>} : memref<10x10x4xf32, #tpu.memory_space<vmem>>, vector<8x8x4xf32>,
    %c0_23 = arith.constant 0 : index
    %c0_24 = arith.constant 0 : index
    %c0_25 = arith.constant 0 : index
    %15 = vector.load %arg5[%c0_23, %c0_24, %c0_25] : memref<10x10x4xf32, #tpu.memory_space<vmem>>, vector<8x8x4xf32>
    %16 = vector.shape_cast %15 : vector<8x8x4xf32> to vector<64x4xf32>
    %c0_26 = arith.constant 0 : index
    %c0_27 = arith.constant 0 : index
    %17 = vector.load %arg6[%c0_26, %c0_27] : memref<64x36xf32, #tpu.memory_space<vmem>>, vector<64x4xf32>
    tpu.vector_store %arg6[%c0_26, %c0_27], %16 {strides = array<i32>} : memref<64x36xf32, #tpu.memory_space<vmem>>, vector<64x4xf32>,
    %c0_28 = arith.constant 0 : index
    %c1_29 = arith.constant 1 : index
    %c0_30 = arith.constant 0 : index
    %18 = vector.load %arg5[%c0_28, %c1_29, %c0_30] : memref<10x10x4xf32, #tpu.memory_space<vmem>>, vector<8x8x4xf32>
    %19 = vector.shape_cast %18 : vector<8x8x4xf32> to vector<64x4xf32>
    %c0_31 = arith.constant 0 : index
    %c4 = arith.constant 4 : index
    %20 = vector.load %arg6[%c0_31, %c4] : memref<64x36xf32, #tpu.memory_space<vmem>>, vector<64x4xf32>
    tpu.vector_store %arg6[%c0_31, %c4], %19 {strides = array<i32>} : memref<64x36xf32, #tpu.memory_space<vmem>>, vector<64x4xf32>,
    %c0_32 = arith.constant 0 : index
    %c2 = arith.constant 2 : index
    %c0_33 = arith.constant 0 : index
    %21 = vector.load %arg5[%c0_32, %c2, %c0_33] : memref<10x10x4xf32, #tpu.memory_space<vmem>>, vector<8x8x4xf32>
    %22 = vector.shape_cast %21 : vector<8x8x4xf32> to vector<64x4xf32>
    %c0_34 = arith.constant 0 : index
    %c8 = arith.constant 8 : index
    %23 = vector.load %arg6[%c0_34, %c8] : memref<64x36xf32, #tpu.memory_space<vmem>>, vector<64x4xf32>
    tpu.vector_store %arg6[%c0_34, %c8], %22 {strides = array<i32>} : memref<64x36xf32, #tpu.memory_space<vmem>>, vector<64x4xf32>,
    %c1_35 = arith.constant 1 : index
    %c0_36 = arith.constant 0 : index
    %c0_37 = arith.constant 0 : index
    %24 = vector.load %arg5[%c1_35, %c0_36, %c0_37] : memref<10x10x4xf32, #tpu.memory_space<vmem>>, vector<8x8x4xf32>
    %25 = vector.shape_cast %24 : vector<8x8x4xf32> to vector<64x4xf32>
    %c0_38 = arith.constant 0 : index
    %c12 = arith.constant 12 : index
    %26 = vector.load %arg6[%c0_38, %c12] : memref<64x36xf32, #tpu.memory_space<vmem>>, vector<64x4xf32>
    tpu.vector_store %arg6[%c0_38, %c12], %25 {strides = array<i32>} : memref<64x36xf32, #tpu.memory_space<vmem>>, vector<64x4xf32>,
    %c1_39 = arith.constant 1 : index
    %c1_40 = arith.constant 1 : index
    %c0_41 = arith.constant 0 : index
    %27 = vector.load %arg5[%c1_39, %c1_40, %c0_41] : memref<10x10x4xf32, #tpu.memory_space<vmem>>, vector<8x8x4xf32>
    %28 = vector.shape_cast %27 : vector<8x8x4xf32> to vector<64x4xf32>
    %c0_42 = arith.constant 0 : index
    %c16 = arith.constant 16 : index
    %29 = vector.load %arg6[%c0_42, %c16] : memref<64x36xf32, #tpu.memory_space<vmem>>, vector<64x4xf32>
    tpu.vector_store %arg6[%c0_42, %c16], %28 {strides = array<i32>} : memref<64x36xf32, #tpu.memory_space<vmem>>, vector<64x4xf32>,
    %c1_43 = arith.constant 1 : index
    %c2_44 = arith.constant 2 : index
    %c0_45 = arith.constant 0 : index
    %30 = vector.load %arg5[%c1_43, %c2_44, %c0_45] : memref<10x10x4xf32, #tpu.memory_space<vmem>>, vector<8x8x4xf32>
    %31 = vector.shape_cast %30 : vector<8x8x4xf32> to vector<64x4xf32>
    %c0_46 = arith.constant 0 : index
    %c20 = arith.constant 20 : index
    %32 = vector.load %arg6[%c0_46, %c20] : memref<64x36xf32, #tpu.memory_space<vmem>>, vector<64x4xf32>
    tpu.vector_store %arg6[%c0_46, %c20], %31 {strides = array<i32>} : memref<64x36xf32, #tpu.memory_space<vmem>>, vector<64x4xf32>,
    %c2_47 = arith.constant 2 : index
    %c0_48 = arith.constant 0 : index
    %c0_49 = arith.constant 0 : index
    %33 = vector.load %arg5[%c2_47, %c0_48, %c0_49] : memref<10x10x4xf32, #tpu.memory_space<vmem>>, vector<8x8x4xf32>
    %34 = vector.shape_cast %33 : vector<8x8x4xf32> to vector<64x4xf32>
    %c0_50 = arith.constant 0 : index
    %c24 = arith.constant 24 : index
    %35 = vector.load %arg6[%c0_50, %c24] : memref<64x36xf32, #tpu.memory_space<vmem>>, vector<64x4xf32>
    tpu.vector_store %arg6[%c0_50, %c24], %34 {strides = array<i32>} : memref<64x36xf32, #tpu.memory_space<vmem>>, vector<64x4xf32>,
    %c2_51 = arith.constant 2 : index
    %c1_52 = arith.constant 1 : index
    %c0_53 = arith.constant 0 : index
    %36 = vector.load %arg5[%c2_51, %c1_52, %c0_53] : memref<10x10x4xf32, #tpu.memory_space<vmem>>, vector<8x8x4xf32>
    %37 = vector.shape_cast %36 : vector<8x8x4xf32> to vector<64x4xf32>
    %c0_54 = arith.constant 0 : index
    %c28 = arith.constant 28 : index
    %38 = vector.load %arg6[%c0_54, %c28] : memref<64x36xf32, #tpu.memory_space<vmem>>, vector<64x4xf32>
    tpu.vector_store %arg6[%c0_54, %c28], %37 {strides = array<i32>} : memref<64x36xf32, #tpu.memory_space<vmem>>, vector<64x4xf32>,
    %c2_55 = arith.constant 2 : index
    %c2_56 = arith.constant 2 : index
    %c0_57 = arith.constant 0 : index
    %39 = vector.load %arg5[%c2_55, %c2_56, %c0_57] : memref<10x10x4xf32, #tpu.memory_space<vmem>>, vector<8x8x4xf32>
    %40 = vector.shape_cast %39 : vector<8x8x4xf32> to vector<64x4xf32>
    %c0_58 = arith.constant 0 : index
    %c32 = arith.constant 32 : index
    %41 = vector.load %arg6[%c0_58, %c32] : memref<64x36xf32, #tpu.memory_space<vmem>>, vector<64x4xf32>
    tpu.vector_store %arg6[%c0_58, %c32], %40 {strides = array<i32>} : memref<64x36xf32, #tpu.memory_space<vmem>>, vector<64x4xf32>,
    %c0_59 = arith.constant 0 : index
    %c0_60 = arith.constant 0 : index
    %42 = vector.load %arg6[%c0_59, %c0_60] : memref<64x36xf32, #tpu.memory_space<vmem>>, vector<64x36xf32>
    %c0_61 = arith.constant 0 : index
    %c0_62 = arith.constant 0 : index
    %43 = vector.load %arg2[%c0_61, %c0_62] : memref<36x8xf32, #tpu.memory_space<vmem>>, vector<36x8xf32>
    %cst_63 = arith.constant dense<0.000000e+00> : vector<64x8xf32>
    %44 = tpu.matmul %42, %43, %cst_63 {dimension_numbers = #tpu.dot_dimension_numbers<[1], [0], [0], [1], [0, 0, 1, 1], [], []>} : vector<64x36xf32>, vector<36x8xf32>, vector<64x8xf32> -> vector<64x8xf32>
    %45 = vector.shape_cast %44 : vector<64x8xf32> to vector<8x8x8xf32>
    %c0_64 = arith.constant 0 : index
    %c0_65 = arith.constant 0 : index
    %c0_66 = arith.constant 0 : index
    %c0_67 = arith.constant 0 : index
    %46 = vector.load %arg3[%c0_64, %c0_65, %c0_66, %c0_67] : memref<1x8x8x8xf32, #tpu.memory_space<vmem>>, vector<1x8x8x8xf32>
    %47 = vector.shape_cast %46 : vector<1x8x8x8xf32> to vector<8x8x8xf32>
    %48 = vector.shape_cast %45 : vector<8x8x8xf32> to vector<1x8x8x8xf32>
    tpu.vector_store %arg3[%c0_64, %c0_65, %c0_66, %c0_67], %48 {strides = array<i32>} : memref<1x8x8x8xf32, #tpu.memory_space<vmem>>, vector<1x8x8x8xf32>,
    %cst_68 = arith.constant dense<0.000000e+00> : vector<8xf32>
    %49 = vector.multi_reduction <add>, %44, %cst_68 [0] : vector<64x8xf32> to vector<8xf32>
    %50 = vector.shape_cast %49 : vector<8xf32> to vector<1x8xf32>
    %c0_69 = arith.constant 0 : index
    %c0_70 = arith.constant 0 : index
    %c0_71 = arith.constant 0 : index
    %51 = vector.load %arg4[%c0_69, %c0_70, %c0_71] : memref<1x2x8xf32, #tpu.memory_space<vmem>>, vector<1x1x8xf32>
    %52 = vector.shape_cast %51 : vector<1x1x8xf32> to vector<1x8xf32>
    %53 = vector.shape_cast %50 : vector<1x8xf32> to vector<1x1x8xf32>
    tpu.vector_store %arg4[%c0_69, %c0_70, %c0_71], %53 {strides = array<i32>} : memref<1x2x8xf32, #tpu.memory_space<vmem>>, vector<1x1x8xf32>,
    %54 = arith.mulf %44, %44 : vector<64x8xf32>
    %cst_72 = arith.constant dense<0.000000e+00> : vector<8xf32>
    %55 = vector.multi_reduction <add>, %54, %cst_72 [0] : vector<64x8xf32> to vector<8xf32>
    %56 = vector.shape_cast %55 : vector<8xf32> to vector<1x8xf32>
    %c0_73 = arith.constant 0 : index
    %c1_74 = arith.constant 1 : index
    %c0_75 = arith.constant 0 : index
    %57 = vector.load %arg4[%c0_73, %c1_74, %c0_75] : memref<1x2x8xf32, #tpu.memory_space<vmem>>, vector<1x1x8xf32>
    %58 = vector.shape_cast %57 : vector<1x1x8xf32> to vector<1x8xf32>
    %59 = vector.shape_cast %56 : vector<1x8xf32> to vector<1x1x8xf32>
    tpu.vector_store %arg4[%c0_73, %c1_74, %c0_75], %59 {strides = array<i32>} : memref<1x2x8xf32, #tpu.memory_space<vmem>>, vector<1x1x8xf32>,
    return
  }
  func.func @transform_0(%arg0: i32) -> (i32, i32, i32, i32, i32) {
    %c0_i32 = arith.constant 0 : i32
    %c0_i32_0 = arith.constant 0 : i32
    %c0_i32_1 = arith.constant 0 : i32
    %c0_i32_2 = arith.constant 0 : i32
    %c0_i32_3 = arith.constant 0 : i32
    return %arg0, %c0_i32, %c0_i32_0, %c0_i32_1, %c0_i32_2 : i32, i32, i32, i32, i32
  }
  func.func @transform_1(%arg0: i32) -> (i32, i32) {
    %c0_i32 = arith.constant 0 : i32
    %c0_i32_0 = arith.constant 0 : i32
    %c0_i32_1 = arith.constant 0 : i32
    return %c0_i32, %c0_i32_0 : i32, i32
  }
  func.func @transform_2(%arg0: i32) -> (i32, i32, i32, i32) {
    %c0_i32 = arith.constant 0 : i32
    %c0_i32_0 = arith.constant 0 : i32
    %c0_i32_1 = arith.constant 0 : i32
    %c0_i32_2 = arith.constant 0 : i32
    return %arg0, %c0_i32, %c0_i32_0, %c0_i32_1 : i32, i32, i32, i32
  }
  func.func @transform_3(%arg0: i32) -> (i32, i32, i32) {
    %c0_i32 = arith.constant 0 : i32
    %c0_i32_0 = arith.constant 0 : i32
    %c0_i32_1 = arith.constant 0 : i32
    return %arg0, %c0_i32, %c0_i32_0 : i32, i32, i32
  }
}

module attributes {stable_mosaic.version = 11 : i64} {
  func.func @_bn1_conv2_kernel(%arg0: i32, %arg1: memref<1x8x8x8xf32, #tpu.memory_space<vmem>>, %arg2: memref<1x8xf32, #tpu.memory_space<vmem>>, %arg3: memref<1x8xf32, #tpu.memory_space<vmem>>, %arg4: memref<72x8xf32, #tpu.memory_space<vmem>>, %arg5: memref<1x8x8x8xf32, #tpu.memory_space<vmem>>, %arg6: memref<1x2x8xf32, #tpu.memory_space<vmem>>, %arg7: memref<10x10x8xf32, #tpu.memory_space<vmem>>, %arg8: memref<64x72xf32, #tpu.memory_space<vmem>>) attributes {dimension_semantics = [#tpu.dimension_semantics<parallel>], iteration_bounds = array<i64: 2>, scalar_prefetch = 0 : i64, scratch_operands = 2 : i64, tpu.core_type = #tpu.core_type<tc>, window_params = [{transform_indices = @transform_0, window_bounds = array<i64: 1, 8, 8, 8>}, {pipeline_mode = #tpu.pipeline_mode<synchronous>, transform_indices = @transform_1, window_bounds = array<i64: 1, 8>}, {pipeline_mode = #tpu.pipeline_mode<synchronous>, transform_indices = @transform_2, window_bounds = array<i64: 1, 8>}, {pipeline_mode = #tpu.pipeline_mode<synchronous>, transform_indices = @transform_3, window_bounds = array<i64: 72, 8>}, {transform_indices = @transform_4, window_bounds = array<i64: 1, 8, 8, 8>}, {transform_indices = @transform_5, window_bounds = array<i64: 1, 2, 8>}]} {
    %c0 = arith.constant 0 : index
    %c0_0 = arith.constant 0 : index
    %c0_1 = arith.constant 0 : index
    %c0_2 = arith.constant 0 : index
    %0 = vector.load %arg1[%c0, %c0_0, %c0_1, %c0_2] : memref<1x8x8x8xf32, #tpu.memory_space<vmem>>, vector<1x8x8x8xf32>
    %1 = vector.shape_cast %0 : vector<1x8x8x8xf32> to vector<8x8x8xf32>
    %c0_3 = arith.constant 0 : index
    %c0_4 = arith.constant 0 : index
    %2 = vector.load %arg2[%c0_3, %c0_4] : memref<1x8xf32, #tpu.memory_space<vmem>>, vector<1x8xf32>
    %3 = vector.shape_cast %2 : vector<1x8xf32> to vector<1x1x8xf32>
    %4 = vector.broadcast %3 : vector<1x1x8xf32> to vector<8x8x8xf32>
    %5 = arith.mulf %1, %4 : vector<8x8x8xf32>
    %c0_5 = arith.constant 0 : index
    %c0_6 = arith.constant 0 : index
    %6 = vector.load %arg3[%c0_5, %c0_6] : memref<1x8xf32, #tpu.memory_space<vmem>>, vector<1x8xf32>
    %7 = vector.shape_cast %6 : vector<1x8xf32> to vector<1x1x8xf32>
    %8 = vector.broadcast %7 : vector<1x1x8xf32> to vector<8x8x8xf32>
    %9 = arith.addf %5, %8 : vector<8x8x8xf32>
    %cst = arith.constant 0.000000e+00 : f32
    %10 = vector.broadcast %cst : f32 to vector<8x8x8xf32>
    %11 = arith.maximumf %9, %10 : vector<8x8x8xf32>
    %cst_7 = arith.constant 0.000000e+00 : f32
    %12 = vector.broadcast %cst_7 : f32 to vector<1x10x8xf32>
    %cst_8 = arith.constant 0.000000e+00 : f32
    %13 = vector.broadcast %cst_8 : f32 to vector<8x1x8xf32>
    %c0_9 = arith.constant 0 : index
    %c0_10 = arith.constant 0 : index
    %c0_11 = arith.constant 0 : index
    %14 = vector.load %arg7[%c0_9, %c0_10, %c0_11] : memref<10x10x8xf32, #tpu.memory_space<vmem>>, vector<1x10x8xf32>
    tpu.vector_store %arg7[%c0_9, %c0_10, %c0_11], %12 {strides = array<i32>} : memref<10x10x8xf32, #tpu.memory_space<vmem>>, vector<1x10x8xf32>,
    %c9 = arith.constant 9 : index
    %c0_12 = arith.constant 0 : index
    %c0_13 = arith.constant 0 : index
    %15 = vector.load %arg7[%c9, %c0_12, %c0_13] : memref<10x10x8xf32, #tpu.memory_space<vmem>>, vector<1x10x8xf32>
    tpu.vector_store %arg7[%c9, %c0_12, %c0_13], %12 {strides = array<i32>} : memref<10x10x8xf32, #tpu.memory_space<vmem>>, vector<1x10x8xf32>,
    %c1 = arith.constant 1 : index
    %c0_14 = arith.constant 0 : index
    %c0_15 = arith.constant 0 : index
    %16 = vector.load %arg7[%c1, %c0_14, %c0_15] : memref<10x10x8xf32, #tpu.memory_space<vmem>>, vector<8x1x8xf32>
    tpu.vector_store %arg7[%c1, %c0_14, %c0_15], %13 {strides = array<i32>} : memref<10x10x8xf32, #tpu.memory_space<vmem>>, vector<8x1x8xf32>,
    %c1_16 = arith.constant 1 : index
    %c9_17 = arith.constant 9 : index
    %c0_18 = arith.constant 0 : index
    %17 = vector.load %arg7[%c1_16, %c9_17, %c0_18] : memref<10x10x8xf32, #tpu.memory_space<vmem>>, vector<8x1x8xf32>
    tpu.vector_store %arg7[%c1_16, %c9_17, %c0_18], %13 {strides = array<i32>} : memref<10x10x8xf32, #tpu.memory_space<vmem>>, vector<8x1x8xf32>,
    %c1_19 = arith.constant 1 : index
    %c1_20 = arith.constant 1 : index
    %c0_21 = arith.constant 0 : index
    %18 = vector.load %arg7[%c1_19, %c1_20, %c0_21] : memref<10x10x8xf32, #tpu.memory_space<vmem>>, vector<8x8x8xf32>
    tpu.vector_store %arg7[%c1_19, %c1_20, %c0_21], %11 {strides = array<i32>} : memref<10x10x8xf32, #tpu.memory_space<vmem>>, vector<8x8x8xf32>,
    %c0_22 = arith.constant 0 : index
    %c0_23 = arith.constant 0 : index
    %c0_24 = arith.constant 0 : index
    %19 = vector.load %arg7[%c0_22, %c0_23, %c0_24] : memref<10x10x8xf32, #tpu.memory_space<vmem>>, vector<8x8x8xf32>
    %20 = vector.shape_cast %19 : vector<8x8x8xf32> to vector<64x8xf32>
    %c0_25 = arith.constant 0 : index
    %c0_26 = arith.constant 0 : index
    %21 = vector.load %arg8[%c0_25, %c0_26] : memref<64x72xf32, #tpu.memory_space<vmem>>, vector<64x8xf32>
    tpu.vector_store %arg8[%c0_25, %c0_26], %20 {strides = array<i32>} : memref<64x72xf32, #tpu.memory_space<vmem>>, vector<64x8xf32>,
    %c0_27 = arith.constant 0 : index
    %c1_28 = arith.constant 1 : index
    %c0_29 = arith.constant 0 : index
    %22 = vector.load %arg7[%c0_27, %c1_28, %c0_29] : memref<10x10x8xf32, #tpu.memory_space<vmem>>, vector<8x8x8xf32>
    %23 = vector.shape_cast %22 : vector<8x8x8xf32> to vector<64x8xf32>
    %c0_30 = arith.constant 0 : index
    %c8 = arith.constant 8 : index
    %24 = vector.load %arg8[%c0_30, %c8] : memref<64x72xf32, #tpu.memory_space<vmem>>, vector<64x8xf32>
    tpu.vector_store %arg8[%c0_30, %c8], %23 {strides = array<i32>} : memref<64x72xf32, #tpu.memory_space<vmem>>, vector<64x8xf32>,
    %c0_31 = arith.constant 0 : index
    %c2 = arith.constant 2 : index
    %c0_32 = arith.constant 0 : index
    %25 = vector.load %arg7[%c0_31, %c2, %c0_32] : memref<10x10x8xf32, #tpu.memory_space<vmem>>, vector<8x8x8xf32>
    %26 = vector.shape_cast %25 : vector<8x8x8xf32> to vector<64x8xf32>
    %c0_33 = arith.constant 0 : index
    %c16 = arith.constant 16 : index
    %27 = vector.load %arg8[%c0_33, %c16] : memref<64x72xf32, #tpu.memory_space<vmem>>, vector<64x8xf32>
    tpu.vector_store %arg8[%c0_33, %c16], %26 {strides = array<i32>} : memref<64x72xf32, #tpu.memory_space<vmem>>, vector<64x8xf32>,
    %c1_34 = arith.constant 1 : index
    %c0_35 = arith.constant 0 : index
    %c0_36 = arith.constant 0 : index
    %28 = vector.load %arg7[%c1_34, %c0_35, %c0_36] : memref<10x10x8xf32, #tpu.memory_space<vmem>>, vector<8x8x8xf32>
    %29 = vector.shape_cast %28 : vector<8x8x8xf32> to vector<64x8xf32>
    %c0_37 = arith.constant 0 : index
    %c24 = arith.constant 24 : index
    %30 = vector.load %arg8[%c0_37, %c24] : memref<64x72xf32, #tpu.memory_space<vmem>>, vector<64x8xf32>
    tpu.vector_store %arg8[%c0_37, %c24], %29 {strides = array<i32>} : memref<64x72xf32, #tpu.memory_space<vmem>>, vector<64x8xf32>,
    %c1_38 = arith.constant 1 : index
    %c1_39 = arith.constant 1 : index
    %c0_40 = arith.constant 0 : index
    %31 = vector.load %arg7[%c1_38, %c1_39, %c0_40] : memref<10x10x8xf32, #tpu.memory_space<vmem>>, vector<8x8x8xf32>
    %32 = vector.shape_cast %31 : vector<8x8x8xf32> to vector<64x8xf32>
    %c0_41 = arith.constant 0 : index
    %c32 = arith.constant 32 : index
    %33 = vector.load %arg8[%c0_41, %c32] : memref<64x72xf32, #tpu.memory_space<vmem>>, vector<64x8xf32>
    tpu.vector_store %arg8[%c0_41, %c32], %32 {strides = array<i32>} : memref<64x72xf32, #tpu.memory_space<vmem>>, vector<64x8xf32>,
    %c1_42 = arith.constant 1 : index
    %c2_43 = arith.constant 2 : index
    %c0_44 = arith.constant 0 : index
    %34 = vector.load %arg7[%c1_42, %c2_43, %c0_44] : memref<10x10x8xf32, #tpu.memory_space<vmem>>, vector<8x8x8xf32>
    %35 = vector.shape_cast %34 : vector<8x8x8xf32> to vector<64x8xf32>
    %c0_45 = arith.constant 0 : index
    %c40 = arith.constant 40 : index
    %36 = vector.load %arg8[%c0_45, %c40] : memref<64x72xf32, #tpu.memory_space<vmem>>, vector<64x8xf32>
    tpu.vector_store %arg8[%c0_45, %c40], %35 {strides = array<i32>} : memref<64x72xf32, #tpu.memory_space<vmem>>, vector<64x8xf32>,
    %c2_46 = arith.constant 2 : index
    %c0_47 = arith.constant 0 : index
    %c0_48 = arith.constant 0 : index
    %37 = vector.load %arg7[%c2_46, %c0_47, %c0_48] : memref<10x10x8xf32, #tpu.memory_space<vmem>>, vector<8x8x8xf32>
    %38 = vector.shape_cast %37 : vector<8x8x8xf32> to vector<64x8xf32>
    %c0_49 = arith.constant 0 : index
    %c48 = arith.constant 48 : index
    %39 = vector.load %arg8[%c0_49, %c48] : memref<64x72xf32, #tpu.memory_space<vmem>>, vector<64x8xf32>
    tpu.vector_store %arg8[%c0_49, %c48], %38 {strides = array<i32>} : memref<64x72xf32, #tpu.memory_space<vmem>>, vector<64x8xf32>,
    %c2_50 = arith.constant 2 : index
    %c1_51 = arith.constant 1 : index
    %c0_52 = arith.constant 0 : index
    %40 = vector.load %arg7[%c2_50, %c1_51, %c0_52] : memref<10x10x8xf32, #tpu.memory_space<vmem>>, vector<8x8x8xf32>
    %41 = vector.shape_cast %40 : vector<8x8x8xf32> to vector<64x8xf32>
    %c0_53 = arith.constant 0 : index
    %c56 = arith.constant 56 : index
    %42 = vector.load %arg8[%c0_53, %c56] : memref<64x72xf32, #tpu.memory_space<vmem>>, vector<64x8xf32>
    tpu.vector_store %arg8[%c0_53, %c56], %41 {strides = array<i32>} : memref<64x72xf32, #tpu.memory_space<vmem>>, vector<64x8xf32>,
    %c2_54 = arith.constant 2 : index
    %c2_55 = arith.constant 2 : index
    %c0_56 = arith.constant 0 : index
    %43 = vector.load %arg7[%c2_54, %c2_55, %c0_56] : memref<10x10x8xf32, #tpu.memory_space<vmem>>, vector<8x8x8xf32>
    %44 = vector.shape_cast %43 : vector<8x8x8xf32> to vector<64x8xf32>
    %c0_57 = arith.constant 0 : index
    %c64 = arith.constant 64 : index
    %45 = vector.load %arg8[%c0_57, %c64] : memref<64x72xf32, #tpu.memory_space<vmem>>, vector<64x8xf32>
    tpu.vector_store %arg8[%c0_57, %c64], %44 {strides = array<i32>} : memref<64x72xf32, #tpu.memory_space<vmem>>, vector<64x8xf32>,
    %c0_58 = arith.constant 0 : index
    %c0_59 = arith.constant 0 : index
    %46 = vector.load %arg8[%c0_58, %c0_59] : memref<64x72xf32, #tpu.memory_space<vmem>>, vector<64x72xf32>
    %c0_60 = arith.constant 0 : index
    %c0_61 = arith.constant 0 : index
    %47 = vector.load %arg4[%c0_60, %c0_61] : memref<72x8xf32, #tpu.memory_space<vmem>>, vector<72x8xf32>
    %cst_62 = arith.constant dense<0.000000e+00> : vector<64x8xf32>
    %48 = tpu.matmul %46, %47, %cst_62 {dimension_numbers = #tpu.dot_dimension_numbers<[1], [0], [0], [1], [0, 0, 1, 1], [], []>} : vector<64x72xf32>, vector<72x8xf32>, vector<64x8xf32> -> vector<64x8xf32>
    %49 = vector.shape_cast %48 : vector<64x8xf32> to vector<8x8x8xf32>
    %c0_63 = arith.constant 0 : index
    %c0_64 = arith.constant 0 : index
    %c0_65 = arith.constant 0 : index
    %c0_66 = arith.constant 0 : index
    %50 = vector.load %arg5[%c0_63, %c0_64, %c0_65, %c0_66] : memref<1x8x8x8xf32, #tpu.memory_space<vmem>>, vector<1x8x8x8xf32>
    %51 = vector.shape_cast %50 : vector<1x8x8x8xf32> to vector<8x8x8xf32>
    %52 = vector.shape_cast %49 : vector<8x8x8xf32> to vector<1x8x8x8xf32>
    tpu.vector_store %arg5[%c0_63, %c0_64, %c0_65, %c0_66], %52 {strides = array<i32>} : memref<1x8x8x8xf32, #tpu.memory_space<vmem>>, vector<1x8x8x8xf32>,
    %cst_67 = arith.constant dense<0.000000e+00> : vector<8xf32>
    %53 = vector.multi_reduction <add>, %48, %cst_67 [0] : vector<64x8xf32> to vector<8xf32>
    %54 = vector.shape_cast %53 : vector<8xf32> to vector<1x8xf32>
    %c0_68 = arith.constant 0 : index
    %c0_69 = arith.constant 0 : index
    %c0_70 = arith.constant 0 : index
    %55 = vector.load %arg6[%c0_68, %c0_69, %c0_70] : memref<1x2x8xf32, #tpu.memory_space<vmem>>, vector<1x1x8xf32>
    %56 = vector.shape_cast %55 : vector<1x1x8xf32> to vector<1x8xf32>
    %57 = vector.shape_cast %54 : vector<1x8xf32> to vector<1x1x8xf32>
    tpu.vector_store %arg6[%c0_68, %c0_69, %c0_70], %57 {strides = array<i32>} : memref<1x2x8xf32, #tpu.memory_space<vmem>>, vector<1x1x8xf32>,
    %58 = arith.mulf %48, %48 : vector<64x8xf32>
    %cst_71 = arith.constant dense<0.000000e+00> : vector<8xf32>
    %59 = vector.multi_reduction <add>, %58, %cst_71 [0] : vector<64x8xf32> to vector<8xf32>
    %60 = vector.shape_cast %59 : vector<8xf32> to vector<1x8xf32>
    %c0_72 = arith.constant 0 : index
    %c1_73 = arith.constant 1 : index
    %c0_74 = arith.constant 0 : index
    %61 = vector.load %arg6[%c0_72, %c1_73, %c0_74] : memref<1x2x8xf32, #tpu.memory_space<vmem>>, vector<1x1x8xf32>
    %62 = vector.shape_cast %61 : vector<1x1x8xf32> to vector<1x8xf32>
    %63 = vector.shape_cast %60 : vector<1x8xf32> to vector<1x1x8xf32>
    tpu.vector_store %arg6[%c0_72, %c1_73, %c0_74], %63 {strides = array<i32>} : memref<1x2x8xf32, #tpu.memory_space<vmem>>, vector<1x1x8xf32>,
    return
  }
  func.func @transform_0(%arg0: i32) -> (i32, i32, i32, i32) {
    %c0_i32 = arith.constant 0 : i32
    %c0_i32_0 = arith.constant 0 : i32
    %c0_i32_1 = arith.constant 0 : i32
    %c0_i32_2 = arith.constant 0 : i32
    return %arg0, %c0_i32, %c0_i32_0, %c0_i32_1 : i32, i32, i32, i32
  }
  func.func @transform_1(%arg0: i32) -> (i32, i32) {
    %c0_i32 = arith.constant 0 : i32
    %c0_i32_0 = arith.constant 0 : i32
    %c0_i32_1 = arith.constant 0 : i32
    return %c0_i32, %c0_i32_0 : i32, i32
  }
  func.func @transform_2(%arg0: i32) -> (i32, i32) {
    %c0_i32 = arith.constant 0 : i32
    %c0_i32_0 = arith.constant 0 : i32
    %c0_i32_1 = arith.constant 0 : i32
    return %c0_i32, %c0_i32_0 : i32, i32
  }
  func.func @transform_3(%arg0: i32) -> (i32, i32) {
    %c0_i32 = arith.constant 0 : i32
    %c0_i32_0 = arith.constant 0 : i32
    %c0_i32_1 = arith.constant 0 : i32
    return %c0_i32, %c0_i32_0 : i32, i32
  }
  func.func @transform_4(%arg0: i32) -> (i32, i32, i32, i32) {
    %c0_i32 = arith.constant 0 : i32
    %c0_i32_0 = arith.constant 0 : i32
    %c0_i32_1 = arith.constant 0 : i32
    %c0_i32_2 = arith.constant 0 : i32
    return %arg0, %c0_i32, %c0_i32_0, %c0_i32_1 : i32, i32, i32, i32
  }
  func.func @transform_5(%arg0: i32) -> (i32, i32, i32) {
    %c0_i32 = arith.constant 0 : i32
    %c0_i32_0 = arith.constant 0 : i32
    %c0_i32_1 = arith.constant 0 : i32
    return %arg0, %c0_i32, %c0_i32_0 : i32, i32, i32
  }
}

</mosaic_0001>

<bundles_post_ra>
// kernel: down_forward.5
= control target key start
LH: loop header
LB: loop body
LE: loop exit
PB: predicated region body
PF: predicated region fallthrough
CT: control target
= control target key end

     0   :  { %s332_s12 = smov 0   ;;  %s363_s0 = inlined_call_operand.vmem [shape: f32[2,8,8,8], index: 0, kind: input, shape index: {}]   ;;  %s364_s1 = inlined_call_operand.vmem [shape: f32[1,8], index: 1, kind: input, shape index: {}]   ;;  %s365_s2 = inlined_call_operand.vmem [shape: f32[1,8], index: 2, kind: input, shape index: {}]   ;;  %s366_s3 = inlined_call_operand.vmem [shape: f32[2,8,8,8], index: 3, kind: output, shape index: {}]  }
   0x1 LB: > { %s281_s13 = sadd.s32 4294967295, %s310_s12   ;;  %p285_p0 = scmp.ge.s32.totalorder %s310_s12, 1  ;;  %s310_s12 = sphi %s332_s12, %s13_s12  }
   0x2   : > { %p137_p1 = scmp.lt.s32.totalorder %s310_s12, 3 }
   0x4   : > { %p138_p2 = pnand %p285_p0, %p137_p1 }
   0x5   : > { %p161_p3 = scmp.lt.s32.totalorder (!%p138_p2), %s281_s13, 1 }
   0x6   : > { %141 = sbr.rel (%p138_p2) target bundleno = 25 (0x19), region = 32 }
   0xb   : > { %s368_s13 = smov (!%p161_p3, %s281_s13), 1  ;;  %v290_v0 = vld [vmem:[%s364_s1] ss:$0 sm:$0xff]  ;;  %vm217_vm0 = vcmask 64512  }
   0xc   : > { %s294_s14 = sshll.u32 %s368_s13, 6  ;;  %v291_v1 = vld [vmem:[%s365_s2] ss:$0 sm:$0xff] }
   0xd   : > { %s165_s19 = scalar_lea.vmem %s363_s0, %s294_s14  ;;  %s170_s24 = scalar_lea.vmem %s366_s3, %s294_s14 }
   0xe   : > { %v171_v2 = vld [vmem:[%s165_s19] sm:$0xff]  ;;  %v172_v3 = vld [vmem:[%s165_s19 + $0x8] sm:$0xff]  ;;  %v173_v4 = vld [vmem:[%s165_s19 + $0x10] sm:$0xff] }
   0xf   : > { %v186_v5 = vmul.f32 %v290_v0, %v171_v2  ;;  %v187_v6 = vmul.f32 %v290_v0, %v172_v3  ;;  %v188_v7 = vmul.f32 %v290_v0, %v173_v4  ;;  %v174_v8 = vld [vmem:[%s165_s19 + $0x18] sm:$0xff]  ;;  %v175_v9 = vld [vmem:[%s165_s19 + $0x20] sm:$0xff]  ;;  %v176_v10 = vld [vmem:[%s165_s19 + $0x28] sm:$0xff] }
  0x10   : > { %v189_v11 = vmul.f32 %v290_v0, %v174_v8  ;;  %v190_v12 = vmul.f32 %v290_v0, %v175_v9  ;;  %v191_v13 = vmul.f32 %v290_v0, %v176_v10  ;;  %v177_v14 = vld [vmem:[%s165_s19 + $0x30] sm:$0xff]  ;;  %v178_v15 = vld [vmem:[%s165_s19 + $0x38] sm:$0xff] }
  0x11   : > { %v201_v16 = vadd.f32 %v291_v1, %v186_v5  ;;  %v202_v17 = vadd.f32 %v291_v1, %v187_v6  ;;  %v203_v18 = vadd.f32 %v291_v1, %v188_v7  ;;  %v192_v19 = vmul.f32 %v290_v0, %v177_v14 }
  0x12   : > { %v204_v20 = vadd.f32 %v291_v1, %v189_v11  ;;  %v205_v21 = vadd.f32 %v291_v1, %v190_v12  ;;  %v206_v22 = vadd.f32 %v291_v1, %v191_v13  ;;  %v193_v23 = vmul.f32 %v290_v0, %v178_v15 }
  0x13   : > { %v209_v24 = vmax.f32 %v201_v16, 0.0  ;;  %v210_v25 = vmax.f32 %v202_v17, 0.0  ;;  %v211_v26 = vmax.f32 %v203_v18, 0.0  ;;  %v207_v27 = vadd.f32 %v291_v1, %v192_v19 }
  0x14   : > { %v212_v28 = vmax.f32 %v204_v20, 0.0  ;;  %v213_v29 = vmax.f32 %v205_v21, 0.0  ;;  %v214_v30 = vmax.f32 %v206_v22, 0.0  ;;  %v208_v31 = vadd.f32 %v291_v1, %v193_v23 }
  0x15   : > { %218 = vst.msk [vmem:[%s170_s24] sm:$0xff] %vm217_vm0, %v209_v24  ;;  %219 = vst.msk [vmem:[%s170_s24 + $0x8] sm:$0xff] %vm217_vm0, %v210_v25  ;;  %v215_v32 = vmax.f32 %v207_v27, 0.0 }
  0x16   : > { %220 = vst.msk [vmem:[%s170_s24 + $0x10] sm:$0xff] %vm217_vm0, %v211_v26  ;;  %221 = vst.msk [vmem:[%s170_s24 + $0x18] sm:$0xff] %vm217_vm0, %v212_v28  ;;  %v216_v33 = vmax.f32 %v208_v31, 0.0 }
  0x17   : > { %222 = vst.msk [vmem:[%s170_s24 + $0x20] sm:$0xff] %vm217_vm0, %v213_v29  ;;  %223 = vst.msk [vmem:[%s170_s24 + $0x28] sm:$0xff] %vm217_vm0, %v214_v30 }
  0x18   : > { %224 = vst.msk [vmem:[%s170_s24 + $0x30] sm:$0xff] %vm217_vm0, %v215_v32  ;;  %225 = vst.msk [vmem:[%s170_s24 + $0x38] sm:$0xff] %vm217_vm0, %v216_v33 }
  0x19 PF: > { %s13_s12 = sadd.s32 1, %s310_s12  }
  0x1a   : > { %p10_p4 = scmp.ge.s32.totalorder %s13_s12, 4  }
  0x1c   :  { %12 = sbr.rel (!%p10_p4) target bundleno = 1 (0x1), region = 62 }

// kernel: down_forward.4
= control target key start
LH: loop header
LB: loop body
LE: loop exit
PB: predicated region body
PF: predicated region fallthrough
CT: control target
= control target key end

     0   :  { %s1170_s18 = smov 0   ;;  %s1467_s0 = inlined_call_operand.vmem [shape: f32[2,8,8,8], index: 0, kind: input, shape index: {}]   ;;  %s1468_s1 = inlined_call_operand.vmem [shape: f32[1,8], index: 1, kind: input, shape index: {}]   ;;  %s1469_s2 = inlined_call_operand.vmem [shape: f32[1,8], index: 2, kind: input, shape index: {}]   ;;  %s1470_s3 = inlined_call_operand.vmem [shape: f32[72,8], index: 3, kind: input, shape index: {}]   ;;  %s1471_s4 = inlined_call_operand.vmem [shape: f32[2,8,8,8], index: 4, kind: output, shape index: {0}]   ;;  %s1472_s5 = inlined_call_operand.vmem [shape: f32[2,2,8], index: 5, kind: output, shape index: {1}]  }
   0x1 LB: > { %s1017_s19 = sadd.s32 4294967295, %s1129_s18   ;;  %p1021_p0 = scmp.ge.s32.totalorder %s1129_s18, 1  ;;  %s1129_s18 = sphi %s1170_s18, %s16_s18  }
   0x2   : > { %p190_p1 = scmp.lt.s32.totalorder %s1129_s18, 3 }
   0x4   : > { %p191_p2 = pnand %p1021_p0, %p190_p1 }
   0x5   : > { %p1182_p3 = scmp.lt.s32.totalorder (!%p191_p2), %s1017_s19, 1  ;;  %s1132_s29 = smov (!%p191_p2), 16  }
   0x6   : > { %194 = sbr.rel (%p191_p2) target bundleno = 490 (0x1ea), region = 36  ;;  %s1133_s30 = smov (!%p191_p2), 8  }
   0x7   : > { %s1134_s6 = smov (!%p191_p2), 24   ;;  %s1135_s7 = smov (!%p191_p2), 32  }
   0x8   : > { %s1136_s8 = smov (!%p191_p2), 40   ;;  %s1137_s11 = smov (!%p191_p2), 48  }
   0x9   : > { %s1138_s20 = smov (!%p191_p2), 56   ;;  %s1139_s28 = smov (!%p191_p2), 64  }
   0xb   : > { %vm282_vm0 = vcmask 64512   ;;  %vm284_vm1 = vcmask 58368   ;;  %vm290_vm2 = vcmask 57344   ;;  %v1131_v0 = vmov 0.0   ;;  %s1475_s19 = smov (!%p1182_p3, %s1017_s19), 1  ;;  %v740_v50 = vld [vmem:[%s1470_s3 + $0x40] sm:$0xff] }
   0xc   : > { %283 = vst.msk [vmem:[#allocation2] sm:$0xff] %vm282_vm0, %v1131_v0  ;;  %287 = vst.msk [vmem:[#allocation2 + $0x90] sm:$0xff] %vm282_vm0, %v1131_v0  ;;  %s1039_s21 = sshll.u32 %s1475_s19, 6  ;;  %v1027_v1 = vld [vmem:[%s1468_s1] ss:$0 sm:$0xff]  ;;  %1058 = vmatprep.subr.mxu0 %v740_v50  ;;  %1088 = vmatprep.subr.mxu1 %v740_v50  ;;  %v739_v52 = vld [vmem:[%s1470_s3 + $0x38] sm:$0xff] }
   0xd   : > { %285 = vst.msk [vmem:[#allocation2 + $0x8] sm:$0x3] %vm284_vm1, %v1131_v0  ;;  %288 = vst.msk [vmem:[#allocation2 + $0x98] sm:$0x3] %vm284_vm1, %v1131_v0  ;;  %s226_s26 = scalar_lea.vmem %s1467_s0, %s1039_s21  ;;  %v1028_v2 = vld [vmem:[%s1469_s2] ss:$0 sm:$0xff]  ;;  %1059 = vmatpush3.msra.mxu0 %v740_v50  ;;  %1097 = vmatpush3.msra.mxu1 %v740_v50 }
   0xe   : > { %299 = vst.msk [vmem:[#allocation2 + $0x19] sm:$0x1] %vm290_vm2, %v1131_v0  ;;  %291 = vst.msk [vmem:[#allocation2 + $0x10] sm:$0x1] %vm290_vm2, %v1131_v0  ;;  %v236_v3 = vld [vmem:[%s226_s26] sm:$0xff]  ;;  %v237_v4 = vld [vmem:[%s226_s26 + $0x8] sm:$0xff]  ;;  %1060 = vmatprep.subr.mxu0 %v739_v52  ;;  %1089 = vmatprep.subr.mxu1 %v739_v52 }
   0xf   : > { %292 = vst.msk [vmem:[#allocation2 + $0x20] sm:$0x1] %vm290_vm2, %v1131_v0  ;;  %293 = vst.msk [vmem:[#allocation2 + $0x30] sm:$0x1] %vm290_vm2, %v1131_v0  ;;  %v238_v5 = vld [vmem:[%s226_s26 + $0x10] sm:$0xff]  ;;  %v251_v8 = vmul.f32 %v1027_v1, %v236_v3  ;;  %v252_v9 = vmul.f32 %v1027_v1, %v237_v4  ;;  %v239_v11 = vld [vmem:[%s226_s26 + $0x18] sm:$0xff]  ;;  %1061 = vmatpush3.msra.mxu0 %v739_v52  ;;  %1098 = vmatpush3.msra.mxu1 %v739_v52 }
  0x10   : > { %294 = vst.msk [vmem:[#allocation2 + $0x40] sm:$0x1] %vm290_vm2, %v1131_v0  ;;  %295 = vst.msk [vmem:[#allocation2 + $0x50] sm:$0x1] %vm290_vm2, %v1131_v0  ;;  %v253_v10 = vmul.f32 %v1027_v1, %v238_v5  ;;  %v254_v12 = vmul.f32 %v1027_v1, %v239_v11  ;;  %v240_v13 = vld [vmem:[%s226_s26 + $0x20] sm:$0xff]  ;;  %v241_v14 = vld [vmem:[%s226_s26 + $0x28] sm:$0xff] }
  0x11   : > { %296 = vst.msk [vmem:[#allocation2 + $0x60] sm:$0x1] %vm290_vm2, %v1131_v0  ;;  %297 = vst.msk [vmem:[#allocation2 + $0x70] sm:$0x1] %vm290_vm2, %v1131_v0  ;;  %v266_v16 = vadd.f32 %v1028_v2, %v251_v8  ;;  %v267_v17 = vadd.f32 %v1028_v2, %v252_v9  ;;  %v255_v19 = vmul.f32 %v1027_v1, %v240_v13  ;;  %v242_v20 = vld [vmem:[%s226_s26 + $0x30] sm:$0xff]  ;;  %v243_v21 = vld [vmem:[%s226_s26 + $0x38] sm:$0xff] }
  0x12   : > { %298 = vst.msk [vmem:[#allocation2 + $0x80] sm:$0x1] %vm290_vm2, %v1131_v0  ;;  %300 = vst.msk [vmem:[#allocation2 + $0x29] sm:$0x1] %vm290_vm2, %v1131_v0  ;;  %v268_v18 = vadd.f32 %v1028_v2, %v253_v10  ;;  %v269_v22 = vadd.f32 %v1028_v2, %v254_v12  ;;  %v256_v23 = vmul.f32 %v1027_v1, %v241_v14  ;;  %v738_v53 = vld [vmem:[%s1470_s3 + $0x30] sm:$0xff]  ;;  %v737_v54 = vld [vmem:[%s1470_s3 + $0x28] sm:$0xff] }
  0x13   : > { %301 = vst.msk [vmem:[#allocation2 + $0x39] sm:$0x1] %vm290_vm2, %v1131_v0  ;;  %302 = vst.msk [vmem:[#allocation2 + $0x49] sm:$0x1] %vm290_vm2, %v1131_v0  ;;  %v315_v15 = vld [vmem:[#allocation2] sm:$0xff]  ;;  %v257_v24 = vmul.f32 %v1027_v1, %v242_v20  ;;  %v258_v25 = vmul.f32 %v1027_v1, %v243_v21  ;;  %v274_v26 = vmax.f32 %v266_v16, 0.0  ;;  %v270_v29 = vadd.f32 %v1028_v2, %v255_v19 }
  0x14   : > { %303 = vst.msk [vmem:[#allocation2 + $0x59] sm:$0x1] %vm290_vm2, %v1131_v0  ;;  %304 = vst.msk [vmem:[#allocation2 + $0x69] sm:$0x1] %vm290_vm2, %v1131_v0  ;;  %v380_v6 = vld [vmem:[#allocation2 + $0x2] sm:$0xff]  ;;  %v275_v27 = vmax.f32 %v267_v17, 0.0  ;;  %v271_v31 = vadd.f32 %v1028_v2, %v256_v23  ;;  %1062 = vmatprep.subr.mxu0 %v738_v53  ;;  %1090 = vmatprep.subr.mxu1 %v738_v53 }
  0x15   : > { %305 = vst.msk [vmem:[#allocation2 + $0x79] sm:$0x1] %vm290_vm2, %v1131_v0  ;;  %306 = vst.msk [vmem:[#allocation2 + $0x89] sm:$0x1] %vm290_vm2, %v1131_v0  ;;  %v331_v7 = vld [vmem:[#allocation2 + $0x1] sm:$0xff]  ;;  %396 = vrot.lane.b32.xlu1 %v380_v6, %s1132_s29  ;;  %v276_v28 = vmax.f32 %v268_v18, 0.0  ;;  %v272_v32 = vadd.f32 %v1028_v2, %v257_v24  ;;  %v273_v33 = vadd.f32 %v1028_v2, %v258_v25  ;;  %1063 = vmatpush3.msra.mxu0 %v738_v53 }
  0x16   : > { %347 = vrot.lane.b32.xlu0 %v331_v7, %s1133_s30  ;;  %323 = vst.msk [vmem:[#allocation3] sm:$0xff] %vm282_vm0, %v315_v15  ;;  %v277_v30 = vmax.f32 %v269_v22, 0.0  ;;  %307 = vst.msk [vmem:[#allocation2 + $0x11] sm:$0xff] %vm282_vm0, %v274_v26  ;;  %v278_v34 = vmax.f32 %v270_v29, 0.0  ;;  %v279_v35 = vmax.f32 %v271_v31, 0.0  ;;  %1099 = vmatpush3.msra.mxu1 %v738_v53  ;;  %v736_v55 = vld [vmem:[%s1470_s3 + $0x20] sm:$0xff] }
  0x17   : > { %308 = vst.msk [vmem:[#allocation2 + $0x21] sm:$0xff] %vm282_vm0, %v275_v27  ;;  %309 = vst.msk [vmem:[#allocation2 + $0x31] sm:$0xff] %vm282_vm0, %v276_v28  ;;  %v280_v36 = vmax.f32 %v272_v32, 0.0  ;;  %v281_v37 = vmax.f32 %v273_v33, 0.0  ;;  %1064 = vmatprep.subr.mxu0 %v737_v54  ;;  %1091 = vmatprep.subr.mxu1 %v737_v54  ;;  %v735_v56 = vld [vmem:[%s1470_s3 + $0x18] sm:$0xff]  ;;  %v734_v57 = vld [vmem:[%s1470_s3 + $0x10] sm:$0xff] }
  0x18   : > { %310 = vst.msk [vmem:[#allocation2 + $0x41] sm:$0xff] %vm282_vm0, %v277_v30  ;;  %311 = vst.msk [vmem:[#allocation2 + $0x51] sm:$0xff] %vm282_vm0, %v278_v34  ;;  %1065 = vmatpush3.msra.mxu0 %v737_v54  ;;  %1100 = vmatpush3.msra.mxu1 %v737_v54  ;;  %v733_v58 = vld [vmem:[%s1470_s3 + $0x8] sm:$0xff]  ;;  %v732_v60 = vld [vmem:[%s1470_s3] sm:$0xff]  ;;  %vm371_vm3 = vcmask 130112   ;;  %vm420_vm4 = vcmask 195712  }
  0x19   : > { %312 = vst.msk [vmem:[#allocation2 + $0x61] sm:$0xff] %vm282_vm0, %v279_v35  ;;  %313 = vst.msk [vmem:[#allocation2 + $0x71] sm:$0xff] %vm282_vm0, %v280_v36  ;;  %1066 = vmatprep.subr.mxu0 %v736_v55  ;;  %1092 = vmatprep.subr.mxu1 %v736_v55  ;;  %v584_v9 = vld [vmem:[#allocation2 + $0x90] sm:$0xff]  ;;  %vm469_vm5 = vcmask 261312   ;;  %vm518_vm6 = vcmask 326912   ;;  %vm567_vm7 = vcmask 392512  }
  0x1a   : > { %314 = vst.msk [vmem:[#allocation2 + $0x81] sm:$0xff] %vm282_vm0, %v281_v37  ;;  %1067 = vmatpush3.msra.mxu0 %v736_v55  ;;  %1101 = vmatpush3.msra.mxu1 %v736_v55  ;;  %v633_v10 = vld [vmem:[#allocation2 + $0x91] sm:$0xff]  ;;  %vm617_vm8 = vcmask 458112   ;;  %vm666_vm9 = vcmask 523712   ;;  %vm715_vm10 = vcmask 589312   ;;  %vm741_vm11 = vcmask 588800  }
  0x1b   : > { %1068 = vmatprep.subr.mxu0 %v735_v56  ;;  %1093 = vmatprep.subr.mxu1 %v735_v56  ;;  %v682_v13 = vld [vmem:[#allocation2 + $0x92] sm:$0xff] }
  0x1c   : > { %1069 = vmatpush3.msra.mxu0 %v735_v56  ;;  %1102 = vmatpush3.msra.mxu1 %v735_v56 }
  0x1d   : > { %v381_v38 = vld [vmem:[#allocation2 + $0x12] sm:$0xff]  ;;  %1070 = vmatprep.subr.mxu0 %v734_v57  ;;  %1094 = vmatprep.subr.mxu1 %v734_v57 }
  0x1e   : > { %v332_v39 = vld [vmem:[#allocation2 + $0x11] sm:$0xff]  ;;  %v430_v40 = vld [vmem:[#allocation2 + $0x20] sm:$0xff]  ;;  %398 = vrot.lane.b32.xlu1 %v381_v38, %s1132_s29  ;;  %1071 = vmatpush3.msra.mxu0 %v734_v57 }
  0x1f   : > { %349 = vrot.lane.b32.xlu0 %v332_v39, %s1133_s30  ;;  %v429_v41 = vld [vmem:[#allocation2 + $0x10] sm:$0xff]  ;;  %325 = vst.msk [vmem:[#allocation3 + $0x10] sm:$0xff] %vm282_vm0, %v430_v40  ;;  %v1235_v43 = vld [vmem:[#allocation2 + $0x40] sm:$0xff]  ;;  %1103 = vmatpush3.msra.mxu1 %v734_v57 }
  0x20   : > { %v431_v42 = vld [vmem:[#allocation2 + $0x30] sm:$0xff]  ;;  %324 = vst.msk [vmem:[#allocation3 + $0x8] sm:$0xff] %vm282_vm0, %v429_v41  ;;  %327 = vst.msk [vmem:[#allocation3 + $0x20] sm:$0xff] %vm282_vm0, %v1235_v43  ;;  %v1244_v45 = vld [vmem:[#allocation2 + $0x60] sm:$0xff]  ;;  %1072 = vmatprep.subr.mxu0 %v733_v58  ;;  %1095 = vmatprep.subr.mxu1 %v733_v58 }
  0x21   : > { %326 = vst.msk [vmem:[#allocation3 + $0x18] sm:$0xff] %vm282_vm0, %v431_v42  ;;  %v1238_v44 = vld [vmem:[#allocation2 + $0x50] sm:$0xff]  ;;  %v333_v46 = vld [vmem:[#allocation2 + $0x21] sm:$0xff]  ;;  %329 = vst.msk [vmem:[#allocation3 + $0x30] sm:$0xff] %vm282_vm0, %v1244_v45  ;;  %1073 = vmatpush3.msra.mxu0 %v733_v58  ;;  %1104 = vmatpush3.msra.mxu1 %v733_v58 }
  0x22   : > { %447 = vrot.lane.b32.xlu1 %v430_v40, %s1134_s6  ;;  %328 = vst.msk [vmem:[#allocation3 + $0x28] sm:$0xff] %vm282_vm0, %v1238_v44  ;;  %v1248_v47 = vld [vmem:[#allocation2 + $0x70] sm:$0xff]  ;;  %v382_v48 = vld [vmem:[#allocation2 + $0x22] sm:$0xff]  ;;  %1074 = vmatprep.subr.mxu0 %v732_v60 }
  0x23   : > { %445 = vrot.lane.b32.xlu0 %v429_v41, %s1134_s6  ;;  %330 = vst.msk [vmem:[#allocation3 + $0x38] sm:$0xff] %vm282_vm0, %v1248_v47  ;;  %v334_v49 = vld [vmem:[#allocation2 + $0x31] sm:$0xff]  ;;  %v481_v59 = vld [vmem:[#allocation2 + $0x41] sm:$0xff]  ;;  %1096 = vmatprep.subr.mxu1 %v732_v60 }
  0x24   : > { %v383_v51 = vld [vmem:[#allocation2 + $0x32] sm:$0xff]  ;;  %1075 = vmatpush3.msra.mxu0 %v732_v60  ;;  %1105 = vmatpush3.msra.mxu1 %v732_v60  ;;  %v384_v61 = vld [vmem:[#allocation2 + $0x42] sm:$0xff] }
  0x25   : > { %v336_v62 = vld [vmem:[#allocation2 + $0x51] sm:$0xff]  ;;  %v483_v0 = vld [vmem:[#allocation2 + $0x61] sm:$0xff] }
  0x26   : > { %351 = vrot.lane.b32.xlu1 %v333_v46, %s1133_s30  ;;  %v385_v63 = vld [vmem:[#allocation2 + $0x52] sm:$0xff]  ;;  %v386_v2 = vld [vmem:[#allocation2 + $0x62] sm:$0xff] }
  0x27   : > { %494 = vrot.lane.b32.xlu0 %v332_v39, %s1135_s7  ;;  %v338_v1 = vld [vmem:[#allocation2 + $0x71] sm:$0xff]  ;;  %v436_v4 = vld [vmem:[#allocation2 + $0x80] sm:$0xff] }
  0x28   : > { %v387_v3 = vld [vmem:[#allocation2 + $0x72] sm:$0xff]  ;;  %v485_v5 = vld [vmem:[#allocation2 + $0x81] sm:$0xff] }
  0x29   : > { %v534_v8 = vld [vmem:[#allocation2 + $0x82] sm:$0xff] }
  0x2a   : > { %543 = vrot.lane.b32.xlu1 %v381_v38, %s1136_s8 }
  0x2b   : > { %496 = vrot.lane.b32.xlu0 %v333_v46, %s1135_s7 }
  0x2e   : > { %400 = vrot.lane.b32.xlu1 %v382_v48, %s1132_s29 }
  0x2f   : > { %353 = vrot.lane.b32.xlu0 %v334_v49, %s1133_s30 }
  0x32   : > { %593 = vrot.lane.b32.xlu1 %v430_v40, %s1137_s11 }
  0x33   : > { %545 = vrot.lane.b32.xlu0 %v382_v48, %s1136_s8 }
  0x36   : > { %449 = vrot.lane.b32.xlu1 %v431_v42, %s1134_s6 }
  0x37   : > { %402 = vrot.lane.b32.xlu0 %v383_v51, %s1132_s29 }
  0x3a   : > { %642 = vrot.lane.b32.xlu1 %v333_v46, %s1138_s20 }
  0x3b   : > { %595 = vrot.lane.b32.xlu0 %v431_v42, %s1137_s11 }
  0x3e   : > { %498 = vrot.lane.b32.xlu1 %v334_v49, %s1135_s7 }
  0x3f   : > { %451 = vrot.lane.b32.xlu0 %v1235_v43, %s1134_s6 }
  0x42   : > { %691 = vrot.lane.b32.xlu1 %v382_v48, %s1139_s28 }
  0x43   : > { %644 = vrot.lane.b32.xlu0 %v334_v49, %s1138_s20 }
  0x46   : > { %500 = vrot.lane.b32.xlu1 %v481_v59, %s1135_s7 }
  0x47   : > { %355 = vrot.lane.b32.xlu0 %v481_v59, %s1133_s30 }
  0x4a   : > { %693 = vrot.lane.b32.xlu1 %v383_v51, %s1139_s28 }
  0x4b   : > { %547 = vrot.lane.b32.xlu0 %v383_v51, %s1136_s8 }
  0x4e   : > { %404 = vrot.lane.b32.xlu1 %v384_v61, %s1132_s29 }
  0x4f   : > { %357 = vrot.lane.b32.xlu0 %v336_v62, %s1133_s30 }
  0x52   : > { %597 = vrot.lane.b32.xlu1 %v1235_v43, %s1137_s11 }
  0x53   : > { %549 = vrot.lane.b32.xlu0 %v384_v61, %s1136_s8 }
  0x56   : > { %453 = vrot.lane.b32.xlu1 %v1238_v44, %s1134_s6 }
  0x57   : > { %406 = vrot.lane.b32.xlu0 %v385_v63, %s1132_s29 }
  0x5a   : > { %646 = vrot.lane.b32.xlu1 %v481_v59, %s1138_s20 }
  0x5b   : > { %599 = vrot.lane.b32.xlu0 %v1238_v44, %s1137_s11 }
  0x5e   : > { %502 = vrot.lane.b32.xlu1 %v336_v62, %s1135_s7 }
  0x5f   : > { %455 = vrot.lane.b32.xlu0 %v1244_v45, %s1134_s6 }
  0x62   : > { %695 = vrot.lane.b32.xlu1 %v384_v61, %s1139_s28 }
  0x63   : > { %648 = vrot.lane.b32.xlu0 %v336_v62, %s1138_s20 }
  0x66   : > { %504 = vrot.lane.b32.xlu1 %v483_v0, %s1135_s7 }
  0x67   : > { %359 = vrot.lane.b32.xlu0 %v483_v0, %s1133_s30 }
  0x6a   : > { %697 = vrot.lane.b32.xlu1 %v385_v63, %s1139_s28 }
  0x6b   : > { %551 = vrot.lane.b32.xlu0 %v385_v63, %s1136_s8 }
  0x6e   : > { %408 = vrot.lane.b32.xlu1 %v386_v2, %s1132_s29 }
  0x6f   : > { %361 = vrot.lane.b32.xlu0 %v338_v1, %s1133_s30 }
  0x72   : > { %601 = vrot.lane.b32.xlu1 %v1244_v45, %s1137_s11 }
  0x73   : > { %553 = vrot.lane.b32.xlu0 %v386_v2, %s1136_s8 }
  0x76   : > { %457 = vrot.lane.b32.xlu1 %v1248_v47, %s1134_s6 }
  0x77   : > { %410 = vrot.lane.b32.xlu0 %v387_v3, %s1132_s29 }
  0x7a   : > { %650 = vrot.lane.b32.xlu1 %v483_v0, %s1138_s20 }
  0x7b   : > { %603 = vrot.lane.b32.xlu0 %v1248_v47, %s1137_s11 }
  0x7e   : > { %506 = vrot.lane.b32.xlu1 %v338_v1, %s1135_s7 }
  0x7f   : > { %459 = vrot.lane.b32.xlu0 %v436_v4, %s1134_s6  ;;  %s1424_s6 = scalar_lea.vmem %s1471_s4, %s1039_s21  ;;  %s1026_s21 = sshll.u32 %s1475_s19, 1 }
  0x82   : > { %699 = vrot.lane.b32.xlu1 %v386_v2, %s1139_s28 }
  0x83   : > { %652 = vrot.lane.b32.xlu0 %v338_v1, %s1138_s20 }
  0x86   : > { %555 = vrot.lane.b32.xlu1 %v387_v3, %s1136_s8 }
  0x87   : > { %v397_v6 = vpop.permute.xlu1 %396  ;;  %508 = vrot.lane.b32.xlu0 %v485_v5, %s1135_s7 }
  0x88   : > { %v348_v7 = vpop.permute.xlu0 %347 }
  0x89   : > { %372 = vst.msk [vmem:[#allocation3] sm:$0xff] %vm371_vm3, %v348_v7 }
  0x8a   : > { %421 = vst.msk [vmem:[#allocation3] sm:$0xff] %vm420_vm4, %v397_v6  ;;  %557 = vrot.lane.b32.xlu1 %v534_v8, %s1136_s8 }
  0x8b   : > { %701 = vrot.lane.b32.xlu0 %v387_v3, %s1139_s28 }
  0x8e   : > { %607 = vrot.lane.b32.xlu1 %v584_v9, %s1137_s11 }
  0x8f   : > { %605 = vrot.lane.b32.xlu0 %v436_v4, %s1137_s11  ;;  %s235_s11 = scalar_lea.vmem %s1472_s5, %s1026_s21 }
  0x90   : > { %v399_v11 = vpop.permute.xlu1 %398 }
  0x91   : > { %v350_v12 = vpop.permute.xlu0 %349 }
  0x92   : > { %373 = vst.msk [vmem:[#allocation3 + $0x8] sm:$0xff] %vm371_vm3, %v350_v12  ;;  %656 = vrot.lane.b32.xlu1 %v633_v10, %s1138_s20 }
  0x93   : > { %654 = vrot.lane.b32.xlu0 %v485_v5, %s1138_s20  ;;  %422 = vst.msk [vmem:[#allocation3 + $0x8] sm:$0xff] %vm420_vm4, %v399_v11 }
  0x94   : > { %v448_v14 = vpop.permute.xlu1 %447 }
  0x95   : > { %v446_v15 = vpop.permute.xlu0 %445  ;;  %471 = vst.msk [vmem:[#allocation3 + $0x8] sm:$0xff] %vm469_vm5, %v448_v14 }
  0x96   : > { %470 = vst.msk [vmem:[#allocation3] sm:$0xff] %vm469_vm5, %v446_v15  ;;  %705 = vrot.lane.b32.xlu1 %v682_v13, %s1139_s28 }
  0x97   : > { %703 = vrot.lane.b32.xlu0 %v534_v8, %s1139_s28 }
  0x98   : > { %v352_v16 = vpop.permute.xlu1 %351 }
  0x99   : > { %v495_v17 = vpop.permute.xlu0 %494  ;;  %374 = vst.msk [vmem:[#allocation3 + $0x10] sm:$0xff] %vm371_vm3, %v352_v16 }
  0x9a   : > { %519 = vst.msk [vmem:[#allocation3] sm:$0xff] %vm518_vm6, %v495_v17 }
  0x9c   : > { %v544_v18 = vpop.permute.xlu1 %543 }
  0x9d   : > { %v497_v19 = vpop.permute.xlu0 %496  ;;  %568 = vst.msk [vmem:[#allocation3] sm:$0xff] %vm567_vm7, %v544_v18 }
  0x9e   : > { %520 = vst.msk [vmem:[#allocation3 + $0x8] sm:$0xff] %vm518_vm6, %v497_v19 }
  0xa0   : > { %v401_v20 = vpop.permute.xlu1 %400 }
  0xa1   : > { %v354_v21 = vpop.permute.xlu0 %353  ;;  %423 = vst.msk [vmem:[#allocation3 + $0x10] sm:$0xff] %vm420_vm4, %v401_v20 }
  0xa2   : > { %375 = vst.msk [vmem:[#allocation3 + $0x18] sm:$0xff] %vm371_vm3, %v354_v21 }
  0xa4   : > { %v594_v22 = vpop.permute.xlu1 %593 }
  0xa5   : > { %v546_v23 = vpop.permute.xlu0 %545  ;;  %618 = vst.msk [vmem:[#allocation3] sm:$0xff] %vm617_vm8, %v594_v22 }
  0xa6   : > { %569 = vst.msk [vmem:[#allocation3 + $0x8] sm:$0xff] %vm567_vm7, %v546_v23 }
  0xa8   : > { %v450_v24 = vpop.permute.xlu1 %449 }
  0xa9   : > { %v403_v25 = vpop.permute.xlu0 %402  ;;  %472 = vst.msk [vmem:[#allocation3 + $0x10] sm:$0xff] %vm469_vm5, %v450_v24 }
  0xaa   : > { %424 = vst.msk [vmem:[#allocation3 + $0x18] sm:$0xff] %vm420_vm4, %v403_v25 }
  0xac   : > { %v643_v26 = vpop.permute.xlu1 %642 }
  0xad   : > { %v596_v27 = vpop.permute.xlu0 %595  ;;  %667 = vst.msk [vmem:[#allocation3] sm:$0xff] %vm666_vm9, %v643_v26 }
  0xae   : > { %619 = vst.msk [vmem:[#allocation3 + $0x8] sm:$0xff] %vm617_vm8, %v596_v27 }
  0xb0   : > { %v499_v28 = vpop.permute.xlu1 %498 }
  0xb1   : > { %v452_v29 = vpop.permute.xlu0 %451  ;;  %521 = vst.msk [vmem:[#allocation3 + $0x10] sm:$0xff] %vm518_vm6, %v499_v28 }
  0xb2   : > { %473 = vst.msk [vmem:[#allocation3 + $0x18] sm:$0xff] %vm469_vm5, %v452_v29 }
  0xb4   : > { %v692_v30 = vpop.permute.xlu1 %691 }
  0xb5   : > { %v645_v31 = vpop.permute.xlu0 %644  ;;  %716 = vst.msk [vmem:[#allocation3] sm:$0xff] %vm715_vm10, %v692_v30 }
  0xb6   : > { %668 = vst.msk [vmem:[#allocation3 + $0x8] sm:$0xff] %vm666_vm9, %v645_v31 }
  0xb8   : > { %v501_v32 = vpop.permute.xlu1 %500 }
  0xb9   : > { %v356_v33 = vpop.permute.xlu0 %355  ;;  %522 = vst.msk [vmem:[#allocation3 + $0x18] sm:$0xff] %vm518_vm6, %v501_v32 }
  0xba   : > { %376 = vst.msk [vmem:[#allocation3 + $0x20] sm:$0xff] %vm371_vm3, %v356_v33 }
  0xbc   : > { %v694_v34 = vpop.permute.xlu1 %693  ;;  %v724_v36 = vld [vmem:[#allocation3] sm:$0xff] }
  0xbd   : > { %v548_v35 = vpop.permute.xlu0 %547  ;;  %717 = vst.msk [vmem:[#allocation3 + $0x8] sm:$0xff] %vm715_vm10, %v694_v34  ;;  %1076 = vmatprep.mubr.msk.f32.mxu0 %vm741_vm11, %v724_v36 }
  0xbe   : > { %570 = vst.msk [vmem:[#allocation3 + $0x10] sm:$0xff] %vm567_vm7, %v548_v35 }
  0xc0   : > { %v405_v37 = vpop.permute.xlu1 %404 }
  0xc1   : > { %v358_v38 = vpop.permute.xlu0 %357  ;;  %425 = vst.msk [vmem:[#allocation3 + $0x20] sm:$0xff] %vm420_vm4, %v405_v37 }
  0xc2   : > { %377 = vst.msk [vmem:[#allocation3 + $0x28] sm:$0xff] %vm371_vm3, %v358_v38 }
  0xc4   : > { %v598_v39 = vpop.permute.xlu1 %597  ;;  %v725_v41 = vld [vmem:[#allocation3 + $0x8] sm:$0xff] }
  0xc5   : > { %v550_v40 = vpop.permute.xlu0 %549  ;;  %620 = vst.msk [vmem:[#allocation3 + $0x10] sm:$0xff] %vm617_vm8, %v598_v39  ;;  %1077 = vmatmul.mubr.msk.f32.vlgmr.msra.gmra.mxu0 %vm741_vm11, %v725_v41 }
  0xc6   : > { %571 = vst.msk [vmem:[#allocation3 + $0x18] sm:$0xff] %vm567_vm7, %v550_v40 }
  0xc8   : > { %v454_v42 = vpop.permute.xlu1 %453 }
  0xc9   : > { %v407_v43 = vpop.permute.xlu0 %406  ;;  %474 = vst.msk [vmem:[#allocation3 + $0x20] sm:$0xff] %vm469_vm5, %v454_v42 }
  0xca   : > { %426 = vst.msk [vmem:[#allocation3 + $0x28] sm:$0xff] %vm420_vm4, %v407_v43 }
  0xcc   : > { %v647_v44 = vpop.permute.xlu1 %646 }
  0xcd   : > { %v600_v45 = vpop.permute.xlu0 %599  ;;  %669 = vst.msk [vmem:[#allocation3 + $0x10] sm:$0xff] %vm666_vm9, %v647_v44 }
  0xce   : > { %621 = vst.msk [vmem:[#allocation3 + $0x18] sm:$0xff] %vm617_vm8, %v600_v45 }
  0xd0   : > { %v503_v46 = vpop.permute.xlu1 %502 }
  0xd1   : > { %v456_v47 = vpop.permute.xlu0 %455  ;;  %523 = vst.msk [vmem:[#allocation3 + $0x20] sm:$0xff] %vm518_vm6, %v503_v46 }
  0xd2   : > { %475 = vst.msk [vmem:[#allocation3 + $0x28] sm:$0xff] %vm469_vm5, %v456_v47 }
  0xd4   : > { %v696_v48 = vpop.permute.xlu1 %695 }
  0xd5   : > { %v649_v49 = vpop.permute.xlu0 %648  ;;  %718 = vst.msk [vmem:[#allocation3 + $0x10] sm:$0xff] %vm715_vm10, %v696_v48 }
  0xd6   : > { %670 = vst.msk [vmem:[#allocation3 + $0x18] sm:$0xff] %vm666_vm9, %v649_v49 }
  0xd8   : > { %v505_v50 = vpop.permute.xlu1 %504 }
  0xd9   : > { %v360_v51 = vpop.permute.xlu0 %359  ;;  %524 = vst.msk [vmem:[#allocation3 + $0x28] sm:$0xff] %vm518_vm6, %v505_v50 }
  0xda   : > { %378 = vst.msk [vmem:[#allocation3 + $0x30] sm:$0xff] %vm371_vm3, %v360_v51 }
  0xdc   : > { %v698_v52 = vpop.permute.xlu1 %697  ;;  %v726_v54 = vld [vmem:[#allocation3 + $0x10] sm:$0xff] }
  0xdd   : > { %v552_v53 = vpop.permute.xlu0 %551  ;;  %719 = vst.msk [vmem:[#allocation3 + $0x18] sm:$0xff] %vm715_vm10, %v698_v52  ;;  %1079 = vmatprep.mubr.msk.f32.mxu0 %vm741_vm11, %v726_v54 }
  0xde   : > { %572 = vst.msk [vmem:[#allocation3 + $0x20] sm:$0xff] %vm567_vm7, %v552_v53 }
  0xe0   : > { %v409_v56 = vpop.permute.xlu1 %408 }
  0xe1   : > { %v362_v55 = vpop.permute.xlu0 %361  ;;  %427 = vst.msk [vmem:[#allocation3 + $0x30] sm:$0xff] %vm420_vm4, %v409_v56 }
  0xe2   : > { %379 = vst.msk [vmem:[#allocation3 + $0x38] sm:$0xff] %vm371_vm3, %v362_v55 }
  0xe4   : > { %v602_v58 = vpop.permute.xlu1 %601  ;;  %v727_v59 = vld [vmem:[#allocation3 + $0x18] sm:$0xff] }
  0xe5   : > { %v554_v57 = vpop.permute.xlu0 %553  ;;  %622 = vst.msk [vmem:[#allocation3 + $0x20] sm:$0xff] %vm617_vm8, %v602_v58  ;;  %1080 = vmatmul.mubr.msk.f32.gmra.mxu0 %vm741_vm11, %v727_v59 }
  0xe6   : > { %573 = vst.msk [vmem:[#allocation3 + $0x28] sm:$0xff] %vm567_vm7, %v554_v57 }
  0xe8   : > { %v458_v61 = vpop.permute.xlu1 %457 }
  0xe9   : > { %v411_v60 = vpop.permute.xlu0 %410  ;;  %476 = vst.msk [vmem:[#allocation3 + $0x30] sm:$0xff] %vm469_vm5, %v458_v61 }
  0xea   : > { %428 = vst.msk [vmem:[#allocation3 + $0x38] sm:$0xff] %vm420_vm4, %v411_v60 }
  0xec   : > { %v651_v63 = vpop.permute.xlu1 %650 }
  0xed   : > { %v604_v62 = vpop.permute.xlu0 %603  ;;  %671 = vst.msk [vmem:[#allocation3 + $0x20] sm:$0xff] %vm666_vm9, %v651_v63 }
  0xee   : > { %623 = vst.msk [vmem:[#allocation3 + $0x28] sm:$0xff] %vm617_vm8, %v604_v62 }
  0xf0   : > { %v507_v1 = vpop.permute.xlu1 %506 }
  0xf1   : > { %v460_v0 = vpop.permute.xlu0 %459  ;;  %525 = vst.msk [vmem:[#allocation3 + $0x30] sm:$0xff] %vm518_vm6, %v507_v1 }
  0xf2   : > { %477 = vst.msk [vmem:[#allocation3 + $0x38] sm:$0xff] %vm469_vm5, %v460_v0 }
  0xf4   : > { %v700_v3 = vpop.permute.xlu1 %699 }
  0xf5   : > { %v653_v2 = vpop.permute.xlu0 %652  ;;  %720 = vst.msk [vmem:[#allocation3 + $0x20] sm:$0xff] %vm715_vm10, %v700_v3 }
  0xf6   : > { %672 = vst.msk [vmem:[#allocation3 + $0x28] sm:$0xff] %vm666_vm9, %v653_v2 }
  0xf8   : > { %v556_v5 = vpop.permute.xlu1 %555 }
  0xf9   : > { %v509_v4 = vpop.permute.xlu0 %508  ;;  %574 = vst.msk [vmem:[#allocation3 + $0x30] sm:$0xff] %vm567_vm7, %v556_v5 }
  0xfa   : > { %526 = vst.msk [vmem:[#allocation3 + $0x38] sm:$0xff] %vm518_vm6, %v509_v4 }
  0xfc   : > { %v558_v7 = vpop.permute.xlu1 %557  ;;  %v728_v8 = vld [vmem:[#allocation3 + $0x20] sm:$0xff] }
  0xfd   : > { %v702_v6 = vpop.permute.xlu0 %701  ;;  %575 = vst.msk [vmem:[#allocation3 + $0x38] sm:$0xff] %vm567_vm7, %v558_v7  ;;  %1082 = vmatprep.mubr.msk.f32.mxu1 %vm741_vm11, %v728_v8 }
  0xfe   : > { %721 = vst.msk [vmem:[#allocation3 + $0x28] sm:$0xff] %vm715_vm10, %v702_v6 }
 0x100   : > { %v608_v10 = vpop.permute.xlu1 %607 }
 0x101   : > { %v606_v9 = vpop.permute.xlu0 %605  ;;  %625 = vst.msk [vmem:[#allocation3 + $0x38] sm:$0xff] %vm617_vm8, %v608_v10 }
 0x102   : > { %624 = vst.msk [vmem:[#allocation3 + $0x30] sm:$0xff] %vm617_vm8, %v606_v9 }
 0x104   : > { %v657_v12 = vpop.permute.xlu1 %656 }
 0x105   : > { %v655_v11 = vpop.permute.xlu0 %654  ;;  %v729_v13 = vld [vmem:[#allocation3 + $0x28] sm:$0xff]  ;;  %674 = vst.msk [vmem:[#allocation3 + $0x38] sm:$0xff] %vm666_vm9, %v657_v12 }
 0x106   : > { %673 = vst.msk [vmem:[#allocation3 + $0x30] sm:$0xff] %vm666_vm9, %v655_v11  ;;  %1083 = vmatmul.mubr.msk.f32.vlgmr.msra.gmra.mxu1 %vm741_vm11, %v729_v13 }
 0x108   : > { %v706_v15 = vpop.permute.xlu1 %705 }
 0x109   : > { %v704_v14 = vpop.permute.xlu0 %703  ;;  %723 = vst.msk [vmem:[#allocation3 + $0x38] sm:$0xff] %vm715_vm10, %v706_v15 }
 0x10a   : > { %722 = vst.msk [vmem:[#allocation3 + $0x30] sm:$0xff] %vm715_vm10, %v704_v14 }
 0x110   : > { %v731_v17 = vld [vmem:[#allocation3 + $0x38] sm:$0xff] }
 0x111   : > { %v730_v16 = vld [vmem:[#allocation3 + $0x30] sm:$0xff] }
 0x112   : > { %1085 = vmatprep.mubr.msk.f32.mxu1 %vm741_vm11, %v730_v16 }
 0x113   : > { %1086 = vmatmul.mubr.msk.f32.gmra.mxu1 %vm741_vm11, %v731_v17 }
 0x185   : > { %v1078_v18 = vpop.f32.mrf.mxu0 }
 0x186   : > { %872 = vst.msk [vmem:[%s1424_s6 + $0x8] sm:$0xff] %vm282_vm0, %v1078_v18  ;;  %v880_v19 = vsel %vm282_vm0, %v1078_v18, 0.0  ;;  %v902_v20 = vmul.f32 %v1078_v18, %v1078_v18 }
 0x187   : > { %v832_v21 = vpop.f32.mrf.mxu0 }
 0x188   : > { %v910_v22 = vsel %vm282_vm0, %v902_v20, 0.0  ;;  %871 = vst.msk [vmem:[%s1424_s6] sm:$0xff] %vm282_vm0, %v832_v21  ;;  %v879_v23 = vsel %vm282_vm0, %v832_v21, 0.0  ;;  %v901_v24 = vmul.f32 %v832_v21, %v832_v21 }
 0x189   : > { %v881_v25 = vadd.f32 %v880_v19, %v879_v23 }
 0x18a   : > { %v909_v26 = vsel %vm282_vm0, %v901_v24, 0.0 }
 0x18b   : > { %v911_v27 = vadd.f32 %v910_v22, %v909_v26 }
 0x1a5   : > { %v1081_v28 = vpop.f32.mrf.mxu0 }
 0x1a6   : > { %874 = vst.msk [vmem:[%s1424_s6 + $0x18] sm:$0xff] %vm282_vm0, %v1081_v28  ;;  %v904_v36 = vmul.f32 %v1081_v28, %v1081_v28  ;;  %v884_v39 = vsel %vm282_vm0, %v1081_v28, 0.0 }
 0x1a7   : > { %v842_v29 = vpop.f32.mrf.mxu0 }
 0x1a8   : > { %873 = vst.msk [vmem:[%s1424_s6 + $0x10] sm:$0xff] %vm282_vm0, %v842_v29  ;;  %v903_v30 = vmul.f32 %v842_v29, %v842_v29  ;;  %v882_v32 = vsel %vm282_vm0, %v842_v29, 0.0  ;;  %v914_v42 = vsel %vm282_vm0, %v904_v36, 0.0 }
 0x1a9   : > { %v883_v35 = vadd.f32 %v882_v32, %v881_v25 }
 0x1aa   : > { %v912_v34 = vsel %vm282_vm0, %v903_v30, 0.0 }
 0x1ab   : > { %v913_v38 = vadd.f32 %v912_v34, %v911_v27  ;;  %v885_v41 = vadd.f32 %v884_v39, %v883_v35 }
 0x1ad   : > { %v915_v44 = vadd.f32 %v914_v42, %v913_v38 }
 0x1c6   : > { %v1084_v31 = vpop.f32.mrf.mxu1 }
 0x1c7   : > { %876 = vst.msk [vmem:[%s1424_s6 + $0x28] sm:$0xff] %vm282_vm0, %v1084_v31  ;;  %v906_v46 = vmul.f32 %v1084_v31, %v1084_v31  ;;  %v888_v49 = vsel %vm282_vm0, %v1084_v31, 0.0 }
 0x1c8   : > { %v852_v33 = vpop.f32.mrf.mxu1 }
 0x1c9   : > { %875 = vst.msk [vmem:[%s1424_s6 + $0x20] sm:$0xff] %vm282_vm0, %v852_v33  ;;  %v905_v37 = vmul.f32 %v852_v33, %v852_v33  ;;  %v886_v40 = vsel %vm282_vm0, %v852_v33, 0.0  ;;  %v918_v52 = vsel %vm282_vm0, %v906_v46, 0.0 }
 0x1ca   : > { %v887_v45 = vadd.f32 %v886_v40, %v885_v41 }
 0x1cb   : > { %v916_v43 = vsel %vm282_vm0, %v905_v37, 0.0 }
 0x1cc   : > { %v917_v47 = vadd.f32 %v916_v43, %v915_v44  ;;  %v889_v51 = vadd.f32 %v888_v49, %v887_v45 }
 0x1ce   : > { %v919_v57 = vadd.f32 %v918_v52, %v917_v47 }
 0x1d3   : > { %v1087_v48 = vpop.f32.mrf.mxu1 }
 0x1d4   : > { %878 = vst.msk [vmem:[%s1424_s6 + $0x38] sm:$0xff] %vm282_vm0, %v1087_v48  ;;  %v908_v53 = vmul.f32 %v1087_v48, %v1087_v48  ;;  %v892_v58 = vsel %vm282_vm0, %v1087_v48, 0.0 }
 0x1d5   : > { %v862_v50 = vpop.f32.mrf.mxu1 }
 0x1d6   : > { %877 = vst.msk [vmem:[%s1424_s6 + $0x30] sm:$0xff] %vm282_vm0, %v862_v50  ;;  %v890_v54 = vsel %vm282_vm0, %v862_v50, 0.0  ;;  %v907_v55 = vmul.f32 %v862_v50, %v862_v50  ;;  %v922_v62 = vsel %vm282_vm0, %v908_v53, 0.0 }
 0x1d7   : > { %v891_v56 = vadd.f32 %v890_v54, %v889_v51 }
 0x1d8   : > { %v920_v59 = vsel %vm282_vm0, %v907_v55, 0.0 }
 0x1d9   : > { %v893_v60 = vadd.f32 %v892_v58, %v891_v56  ;;  %v921_v61 = vadd.f32 %v920_v59, %v919_v57 }
 0x1db   : > { %v894_v63 = vrot.slane %v893_v60, 4  ;;  %v923_v0 = vadd.f32 %v922_v62, %v921_v61 }
 0x1dd   : > { %v895_v1 = vadd.f32 %v894_v63, %v893_v60  ;;  %v924_v2 = vrot.slane %v923_v0, 4 }
 0x1df   : > { %v896_v3 = vrot.slane %v895_v1, 2  ;;  %v925_v4 = vadd.f32 %v924_v2, %v923_v0 }
 0x1e1   : > { %v897_v5 = vadd.f32 %v896_v3, %v895_v1  ;;  %v926_v6 = vrot.slane %v925_v4, 2 }
 0x1e3   : > { %v898_v7 = vrot.slane %v897_v5, 1  ;;  %v927_v8 = vadd.f32 %v926_v6, %v925_v4 }
 0x1e5   : > { %v899_v9 = vadd.f32 %v898_v7, %v897_v5  ;;  %v928_v10 = vrot.slane %v927_v8, 1 }
 0x1e7   : > { %900 = vst.msk [vmem:[%s235_s11] sm:$0x1] %vm290_vm2, %v899_v9  ;;  %v929_v11 = vadd.f32 %v928_v10, %v927_v8 }
 0x1e9   : > { %930 = vst.msk [vmem:[%s235_s11 + $0x1] sm:$0x1] %vm290_vm2, %v929_v11 }
 0x1ea PF: > { %s16_s18 = sadd.s32 1, %s1129_s18  }
 0x1eb   : > { %p13_p4 = scmp.ge.s32.totalorder %s16_s18, 4  }
 0x1ed   :  { %15 = sbr.rel (!%p13_p4) target bundleno = 1 (0x1), region = 81 }

// kernel: down_forward.3
= control target key start
LH: loop header
LB: loop body
LE: loop exit
PB: predicated region body
PF: predicated region fallthrough
CT: control target
= control target key end

     0   :  { %s1116_s12 = smov 0   ;;  %s1393_s0 = inlined_call_operand.vmem [shape: f32[2,8,2,8,8], index: 0, kind: input, shape index: {}]   ;;  %s1394_s1 = inlined_call_operand.vmem [shape: f32[36,8], index: 1, kind: input, shape index: {}]   ;;  %s1395_s2 = inlined_call_operand.vmem [shape: f32[2,8,8,8], index: 2, kind: output, shape index: {0}]   ;;  %s1396_s3 = inlined_call_operand.vmem [shape: f32[2,2,8], index: 3, kind: output, shape index: {1}]  }
   0x1 LB: > { %s984_s13 = sadd.s32 4294967295, %s1084_s12   ;;  %p988_p0 = scmp.ge.s32.totalorder %s1084_s12, 1  ;;  %s1084_s12 = sphi %s1116_s12, %s14_s12  }
   0x2   : > { %p140_p1 = scmp.lt.s32.totalorder %s1084_s12, 3 }
   0x4   : > { %p141_p2 = pnand %p988_p0, %p140_p1 }
   0x5   : > { %p1126_p3 = scmp.lt.s32.totalorder (!%p141_p2), %s984_s13, 1  ;;  %s1087_s19 = smov (!%p141_p2), 124  }
   0x6   : > { %144 = sbr.rel (%p141_p2) target bundleno = 601 (0x259), region = 28  ;;  %s1088_s20 = smov (!%p141_p2), 4  }
   0x7   : > { %s1089_s21 = smov (!%p141_p2), 24   ;;  %s1090_s22 = smov (!%p141_p2), 8  }
   0x8   : > { %s1091_s23 = smov (!%p141_p2), 12   ;;  %s1092_s24 = smov (!%p141_p2), 16  }
   0x9   : > { %s1093_s25 = smov (!%p141_p2), 20   ;;  %s1094_s28 = smov (!%p141_p2), 28  }
   0xa   : > { %s1095_s8 = smov (!%p141_p2), 32  }
   0xb   : > { %vm247_vm0 = vcmask 31744   ;;  %vm249_vm1 = vcmask 25600   ;;  %vm255_vm2 = vcmask 24576   ;;  %v1086_v0 = vmov 0.0   ;;  %s1399_s13 = smov (!%p1126_p3, %s984_s13), 1  ;;  %v700_v61 = vld [vmem:[%s1394_s1 + $0x18] sm:$0xff] }
   0xc   : > { %248 = vst.msk [vmem:[#allocation2] sm:$0xff] %vm247_vm0, %v1086_v0  ;;  %252 = vst.msk [vmem:[#allocation2 + $0x90] sm:$0xff] %vm247_vm0, %v1086_v0  ;;  %s1013_s15 = sshll.u32 %s1399_s13, 7  ;;  %vm336_vm3 = vcmask 64544   ;;  %vm385_vm4 = vcmask 97344   ;;  %vm727_vm5 = vcmask 1043456  }
   0xd   : > { %250 = vst.msk [vmem:[#allocation2 + $0x8] sm:$0x3] %vm249_vm1, %v1086_v0  ;;  %253 = vst.msk [vmem:[#allocation2 + $0x98] sm:$0x3] %vm249_vm1, %v1086_v0  ;;  %s172_s18 = scalar_lea.vmem %s1393_s0, %s1013_s15  ;;  %v701_v60 = vld [vmem:[%s1394_s1 + $0x20] sm:$0xf] }
   0xe   : > { %256 = vst.msk [vmem:[#allocation2 + $0x10] sm:$0x1] %vm255_vm2, %v1086_v0  ;;  %257 = vst.msk [vmem:[#allocation2 + $0x20] sm:$0x1] %vm255_vm2, %v1086_v0  ;;  %v182_v1 = vld [vmem:[%s172_s18] sm:$0xff]  ;;  %v994_v2 = vld [vmem:[%s172_s18 + $0x8] sm:$0xff]  ;;  %1028 = vmatprep.subr.msk.mxu0 %vm727_vm5, %v701_v60  ;;  %1050 = vmatprep.subr.msk.mxu1 %vm727_vm5, %v701_v60 }
   0xf   : > { %258 = vst.msk [vmem:[#allocation2 + $0x30] sm:$0x1] %vm255_vm2, %v1086_v0  ;;  %259 = vst.msk [vmem:[#allocation2 + $0x40] sm:$0x1] %vm255_vm2, %v1086_v0  ;;  %v183_v3 = vld [vmem:[%s172_s18 + $0x10] sm:$0xff]  ;;  %v199_v4 = vmax.f32 %v182_v1, %v994_v2  ;;  %v995_v5 = vld [vmem:[%s172_s18 + $0x18] sm:$0xff]  ;;  %1029 = vmatpush3.msk.msra.mxu0 %vm727_vm5, %v701_v60  ;;  %1055 = vmatpush3.msk.msra.mxu1 %vm727_vm5, %v701_v60 }
  0x10   : > { %260 = vst.msk [vmem:[#allocation2 + $0x50] sm:$0x1] %vm255_vm2, %v1086_v0  ;;  %261 = vst.msk [vmem:[#allocation2 + $0x60] sm:$0x1] %vm255_vm2, %v1086_v0  ;;  %v184_v6 = vld [vmem:[%s172_s18 + $0x20] sm:$0xff]  ;;  %v996_v7 = vld [vmem:[%s172_s18 + $0x28] sm:$0xff]  ;;  %v200_v11 = vmax.f32 %v183_v3, %v995_v5  ;;  %1030 = vmatprep.subr.mxu0 %v700_v61  ;;  %1051 = vmatprep.subr.mxu1 %v700_v61 }
  0x11   : > { %262 = vst.msk [vmem:[#allocation2 + $0x70] sm:$0x1] %vm255_vm2, %v1086_v0  ;;  %263 = vst.msk [vmem:[#allocation2 + $0x80] sm:$0x1] %vm255_vm2, %v1086_v0  ;;  %v201_v8 = vmax.f32 %v184_v6, %v996_v7  ;;  %v185_v9 = vld [vmem:[%s172_s18 + $0x30] sm:$0xff]  ;;  %v997_v10 = vld [vmem:[%s172_s18 + $0x38] sm:$0xff]  ;;  %215 = vrot.lane.b32.xlu0 %v199_v4, %s1087_s19  ;;  %1031 = vmatpush3.msra.mxu0 %v700_v61 }
  0x12   : > { %264 = vst.msk [vmem:[#allocation2 + $0x19] sm:$0x1] %vm255_vm2, %v1086_v0  ;;  %265 = vst.msk [vmem:[#allocation2 + $0x29] sm:$0x1] %vm255_vm2, %v1086_v0  ;;  %v202_v12 = vmax.f32 %v185_v9, %v997_v10  ;;  %v186_v13 = vld [vmem:[%s172_s18 + $0x40] sm:$0xff]  ;;  %v998_v14 = vld [vmem:[%s172_s18 + $0x48] sm:$0xff]  ;;  %1056 = vmatpush3.msra.mxu1 %v700_v61 }
  0x13   : > { %266 = vst.msk [vmem:[#allocation2 + $0x39] sm:$0x1] %vm255_vm2, %v1086_v0  ;;  %267 = vst.msk [vmem:[#allocation2 + $0x49] sm:$0x1] %vm255_vm2, %v1086_v0  ;;  %219 = vrot.lane.b32.xlu1 %v201_v8, %s1087_s19  ;;  %v187_v15 = vld [vmem:[%s172_s18 + $0x50] sm:$0xff]  ;;  %v999_v16 = vld [vmem:[%s172_s18 + $0x58] sm:$0xff]  ;;  %v203_v17 = vmax.f32 %v186_v13, %v998_v14 }
  0x14   : > { %268 = vst.msk [vmem:[#allocation2 + $0x59] sm:$0x1] %vm255_vm2, %v1086_v0  ;;  %269 = vst.msk [vmem:[#allocation2 + $0x69] sm:$0x1] %vm255_vm2, %v1086_v0  ;;  %v204_v18 = vmax.f32 %v187_v15, %v999_v16  ;;  %v188_v19 = vld [vmem:[%s172_s18 + $0x60] sm:$0xff]  ;;  %v1000_v20 = vld [vmem:[%s172_s18 + $0x68] sm:$0xff] }
  0x15   : > { %270 = vst.msk [vmem:[#allocation2 + $0x79] sm:$0x1] %vm255_vm2, %v1086_v0  ;;  %271 = vst.msk [vmem:[#allocation2 + $0x89] sm:$0x1] %vm255_vm2, %v1086_v0  ;;  %217 = vrot.lane.b32.xlu0 %v200_v11, %s1087_s19  ;;  %v189_v21 = vld [vmem:[%s172_s18 + $0x70] sm:$0xff]  ;;  %v1001_v22 = vld [vmem:[%s172_s18 + $0x78] sm:$0xff]  ;;  %v205_v23 = vmax.f32 %v188_v19, %v1000_v20 }
  0x16   : > { %v206_v24 = vmax.f32 %v189_v21, %v1001_v22  ;;  %v296_v25 = vld [vmem:[#allocation2 + $0x1] sm:$0xff]  ;;  %v549_v26 = vld [vmem:[#allocation2 + $0x90] sm:$0xff]  ;;  %vm434_vm6 = vcmask 130144   ;;  %vm483_vm7 = vcmask 162944   ;;  %vm532_vm8 = vcmask 195744   ;;  %s1014_s11 = sshll.u32 %s1399_s13, 6 }
  0x17   : > { %221 = vrot.lane.b32.xlu1 %v202_v12, %s1087_s19  ;;  %v345_v27 = vld [vmem:[#allocation2 + $0x2] sm:$0xff]  ;;  %v699_v63 = vld [vmem:[%s1394_s1 + $0x10] sm:$0xff]  ;;  %vm582_vm9 = vcmask 228544   ;;  %vm631_vm10 = vcmask 261344   ;;  %vm680_vm11 = vcmask 294144   ;;  %vm702_vm12 = vcmask 293888   ;;  %s1352_s16 = scalar_lea.vmem %s1395_s2, %s1014_s11 }
  0x18   : > { %v280_v28 = vld [vmem:[#allocation2] sm:$0xff]  ;;  %1032 = vmatprep.subr.mxu0 %v699_v63  ;;  %v698_v0 = vld [vmem:[%s1394_s1 + $0x8] sm:$0xff]  ;;  %1052 = vmatprep.subr.mxu1 %v699_v63  ;;  %v598_v13 = vld [vmem:[#allocation2 + $0x91] sm:$0xff]  ;;  %vm836_vm13 = vcmask 64512   ;;  %s993_s17 = sshll.u32 %s1399_s13, 1  ;;  %vm866_vm14 = vcmask 57344  }
  0x19   : > { %223 = vrot.lane.b32.xlu0 %v203_v17, %s1087_s19  ;;  %288 = vst.msk [vmem:[#allocation3] sm:$0xff] %vm247_vm0, %v280_v28  ;;  %1033 = vmatpush3.msra.mxu0 %v699_v63  ;;  %v697_v1 = vld [vmem:[%s1394_s1] sm:$0xff]  ;;  %v647_v16 = vld [vmem:[#allocation2 + $0x92] sm:$0xff] }
  0x1a   : > { %1057 = vmatpush3.msra.mxu1 %v699_v63  ;;  %1034 = vmatprep.subr.mxu0 %v698_v0 }
  0x1b   : > { %225 = vrot.lane.b32.xlu1 %v204_v18, %s1087_s19  ;;  %1053 = vmatprep.subr.mxu1 %v698_v0 }
  0x1c   : > { %1035 = vmatpush3.msra.mxu0 %v698_v0  ;;  %1058 = vmatpush3.msra.mxu1 %v698_v0 }
  0x1d   : > { %227 = vrot.lane.b32.xlu0 %v205_v23, %s1087_s19  ;;  %1036 = vmatprep.subr.mxu0 %v697_v1 }
  0x1e   : > { %1054 = vmatprep.subr.mxu1 %v697_v1  ;;  %1037 = vmatpush3.msra.mxu0 %v697_v1 }
  0x1f   : > { %229 = vrot.lane.b32.xlu1 %v206_v24, %s1087_s19  ;;  %1059 = vmatpush3.msra.mxu1 %v697_v1 }
  0x21   : > { %312 = vrot.lane.b32.xlu0 %v296_v25, %s1088_s20 }
  0x23   : > { %572 = vrot.lane.b32.xlu1 %v549_v26, %s1089_s21 }
  0x25   : > { %361 = vrot.lane.b32.xlu0 %v345_v27, %s1090_s22 }
  0x83   : > { %v216_v29 = vpop.permute.xlu0 %215 }
  0x84   : > { %v239_v30 = vmax.f32 %v199_v4, %v216_v29 }
  0x85   : > { %v220_v31 = vpop.permute.xlu1 %219 }
  0x86   : > { %v241_v32 = vmax.f32 %v201_v8, %v220_v31  ;;  %272 = vst.msk [vmem:[#allocation2 + $0x11] sm:$0xff] %vm247_vm0, %v239_v30 }
  0x87   : > { %v218_v33 = vpop.permute.xlu0 %217 }
  0x88   : > { %274 = vst.msk [vmem:[#allocation2 + $0x31] sm:$0xff] %vm247_vm0, %v241_v32  ;;  %v240_v34 = vmax.f32 %v200_v11, %v218_v33 }
  0x89   : > { %v222_v35 = vpop.permute.xlu1 %221 }
  0x8a   : > { %v242_v36 = vmax.f32 %v202_v12, %v222_v35  ;;  %273 = vst.msk [vmem:[#allocation2 + $0x21] sm:$0xff] %vm247_vm0, %v240_v34 }
  0x8b   : > { %v224_v37 = vpop.permute.xlu0 %223 }
  0x8c   : > { %275 = vst.msk [vmem:[#allocation2 + $0x41] sm:$0xff] %vm247_vm0, %v242_v36  ;;  %v243_v38 = vmax.f32 %v203_v17, %v224_v37 }
  0x8d   : > { %v226_v39 = vpop.permute.xlu1 %225  ;;  %v394_v40 = vld [vmem:[#allocation2 + $0x10] sm:$0xff] }
  0x8e   : > { %v297_v41 = vld [vmem:[#allocation2 + $0x11] sm:$0xff]  ;;  %v244_v42 = vmax.f32 %v204_v18, %v226_v39  ;;  %410 = vrot.lane.b32.xlu0 %v394_v40, %s1091_s23  ;;  %276 = vst.msk [vmem:[#allocation2 + $0x51] sm:$0xff] %vm247_vm0, %v243_v38  ;;  %289 = vst.msk [vmem:[#allocation3 + $0x8] sm:$0xff] %vm247_vm0, %v394_v40 }
  0x8f   : > { %314 = vrot.lane.b32.xlu1 %v297_v41, %s1088_s20  ;;  %v543_v43 = vld [vmem:[#allocation2 + $0x30] sm:$0xff]  ;;  %v228_v44 = vpop.permute.xlu0 %227 }
  0x90   : > { %277 = vst.msk [vmem:[#allocation2 + $0x61] sm:$0xff] %vm247_vm0, %v244_v42  ;;  %291 = vst.msk [vmem:[#allocation3 + $0x18] sm:$0xff] %vm247_vm0, %v543_v43  ;;  %v245_v45 = vmax.f32 %v205_v23, %v228_v44  ;;  %v346_v47 = vld [vmem:[#allocation2 + $0x12] sm:$0xff] }
  0x91   : > { %v230_v46 = vpop.permute.xlu1 %229  ;;  %v395_v48 = vld [vmem:[#allocation2 + $0x20] sm:$0xff]  ;;  %v299_v55 = vld [vmem:[#allocation2 + $0x31] sm:$0xff] }
  0x92   : > { %v246_v49 = vmax.f32 %v206_v24, %v230_v46  ;;  %459 = vrot.lane.b32.xlu0 %v297_v41, %s1092_s24  ;;  %278 = vst.msk [vmem:[#allocation2 + $0x71] sm:$0xff] %vm247_vm0, %v245_v45  ;;  %290 = vst.msk [vmem:[#allocation3 + $0x10] sm:$0xff] %vm247_vm0, %v395_v48  ;;  %v444_v51 = vld [vmem:[#allocation2 + $0x21] sm:$0xff]  ;;  %v348_v59 = vld [vmem:[#allocation2 + $0x32] sm:$0xff] }
  0x93   : > { %363 = vrot.lane.b32.xlu1 %v346_v47, %s1090_s22  ;;  %v1174_v50 = vld [vmem:[#allocation2 + $0x40] sm:$0xff]  ;;  %v313_v52 = vpop.permute.xlu0 %312 }
  0x94   : > { %279 = vst.msk [vmem:[#allocation2 + $0x81] sm:$0xff] %vm247_vm0, %v246_v49  ;;  %292 = vst.msk [vmem:[#allocation3 + $0x20] sm:$0xff] %vm247_vm0, %v1174_v50  ;;  %v493_v58 = vld [vmem:[#allocation2 + $0x22] sm:$0xff] }
  0x95   : > { %337 = vst.msk [vmem:[#allocation3] sm:$0xff] %vm336_vm3, %v313_v52  ;;  %v1182_v53 = vld [vmem:[#allocation2 + $0x50] sm:$0xff]  ;;  %v300_v62 = vld [vmem:[#allocation2 + $0x41] sm:$0xff]  ;;  %v1270_v11 = vpop.permute.xlu1 %572 }
  0x96   : > { %461 = vrot.lane.b32.xlu0 %v444_v51, %s1092_s24  ;;  %293 = vst.msk [vmem:[#allocation3 + $0x28] sm:$0xff] %vm247_vm0, %v1182_v53  ;;  %v301_v2 = vld [vmem:[#allocation2 + $0x51] sm:$0xff]  ;;  %v495_v3 = vld [vmem:[#allocation2 + $0x42] sm:$0xff] }
  0x97   : > { %412 = vrot.lane.b32.xlu1 %v395_v48, %s1091_s23  ;;  %v1186_v54 = vld [vmem:[#allocation2 + $0x60] sm:$0xff]  ;;  %v362_v56 = vpop.permute.xlu0 %361  ;;  %v350_v4 = vld [vmem:[#allocation2 + $0x52] sm:$0xff] }
  0x98   : > { %294 = vst.msk [vmem:[#allocation3 + $0x30] sm:$0xff] %vm247_vm0, %v1186_v54  ;;  %v302_v5 = vld [vmem:[#allocation2 + $0x61] sm:$0xff] }
  0x99   : > { %386 = vst.msk [vmem:[#allocation3] sm:$0xff] %vm385_vm4, %v362_v56  ;;  %v1193_v57 = vld [vmem:[#allocation2 + $0x70] sm:$0xff]  ;;  %v497_v7 = vld [vmem:[#allocation2 + $0x62] sm:$0xff] }
  0x9a   : > { %318 = vrot.lane.b32.xlu0 %v299_v55, %s1088_s20  ;;  %295 = vst.msk [vmem:[#allocation3 + $0x38] sm:$0xff] %vm247_vm0, %v1193_v57  ;;  %v303_v6 = vld [vmem:[#allocation2 + $0x71] sm:$0xff] }
  0x9b   : > { %316 = vrot.lane.b32.xlu1 %v444_v51, %s1088_s20  ;;  %v352_v8 = vld [vmem:[#allocation2 + $0x72] sm:$0xff]  ;;  %v401_v9 = vld [vmem:[#allocation2 + $0x80] sm:$0xff] }
  0x9c   : > { %v450_v10 = vld [vmem:[#allocation2 + $0x81] sm:$0xff] }
  0x9d   : > { %v499_v12 = vld [vmem:[#allocation2 + $0x82] sm:$0xff] }
  0x9e   : > { %510 = vrot.lane.b32.xlu0 %v493_v58, %s1093_s25 }
  0x9f   : > { %508 = vrot.lane.b32.xlu1 %v346_v47, %s1093_s25 }
  0xa2   : > { %367 = vrot.lane.b32.xlu0 %v348_v59, %s1090_s22 }
  0xa3   : > { %365 = vrot.lane.b32.xlu1 %v493_v58, %s1090_s22 }
  0xa6   : > { %560 = vrot.lane.b32.xlu0 %v543_v43, %s1089_s21 }
  0xa7   : > { %558 = vrot.lane.b32.xlu1 %v395_v48, %s1089_s21 }
  0xaa   : > { %416 = vrot.lane.b32.xlu0 %v1174_v50, %s1091_s23 }
  0xab   : > { %414 = vrot.lane.b32.xlu1 %v543_v43, %s1091_s23 }
  0xae   : > { %609 = vrot.lane.b32.xlu0 %v299_v55, %s1094_s28 }
  0xaf   : > { %607 = vrot.lane.b32.xlu1 %v444_v51, %s1094_s28 }
  0xb2   : > { %320 = vrot.lane.b32.xlu0 %v300_v62, %s1088_s20 }
  0xb3   : > { %463 = vrot.lane.b32.xlu1 %v299_v55, %s1092_s24 }
  0xb6   : > { %512 = vrot.lane.b32.xlu0 %v348_v59, %s1093_s25 }
  0xb7   : > { %656 = vrot.lane.b32.xlu1 %v493_v58, %s1095_s8 }
  0xba   : > { %322 = vrot.lane.b32.xlu0 %v301_v2, %s1088_s20 }
  0xbb   : > { %465 = vrot.lane.b32.xlu1 %v300_v62, %s1092_s24 }
  0xbe   : > { %514 = vrot.lane.b32.xlu0 %v495_v3, %s1093_s25 }
  0xbf   : > { %658 = vrot.lane.b32.xlu1 %v348_v59, %s1095_s8 }
  0xc2   : > { %371 = vrot.lane.b32.xlu0 %v350_v4, %s1090_s22 }
  0xc3   : > { %369 = vrot.lane.b32.xlu1 %v495_v3, %s1090_s22 }
  0xc6   : > { %564 = vrot.lane.b32.xlu0 %v1182_v53, %s1089_s21 }
  0xc7   : > { %562 = vrot.lane.b32.xlu1 %v1174_v50, %s1089_s21 }
  0xca   : > { %420 = vrot.lane.b32.xlu0 %v1186_v54, %s1091_s23 }
  0xcb   : > { %418 = vrot.lane.b32.xlu1 %v1182_v53, %s1091_s23 }
  0xce   : > { %613 = vrot.lane.b32.xlu0 %v301_v2, %s1094_s28 }
  0xcf   : > { %611 = vrot.lane.b32.xlu1 %v300_v62, %s1094_s28 }
  0xd2   : > { %324 = vrot.lane.b32.xlu0 %v302_v5, %s1088_s20 }
  0xd3   : > { %467 = vrot.lane.b32.xlu1 %v301_v2, %s1092_s24 }
  0xd6   : > { %516 = vrot.lane.b32.xlu0 %v350_v4, %s1093_s25 }
  0xd7   : > { %660 = vrot.lane.b32.xlu1 %v495_v3, %s1095_s8 }
  0xda   : > { %326 = vrot.lane.b32.xlu0 %v303_v6, %s1088_s20  ;;  %s181_s20 = scalar_lea.vmem %s1396_s3, %s993_s17 }
  0xdb   : > { %469 = vrot.lane.b32.xlu1 %v302_v5, %s1092_s24 }
  0xde   : > { %518 = vrot.lane.b32.xlu0 %v497_v7, %s1093_s25 }
  0xdf   : > { %662 = vrot.lane.b32.xlu1 %v350_v4, %s1095_s8 }
  0xe2   : > { %375 = vrot.lane.b32.xlu0 %v352_v8, %s1090_s22 }
  0xe3   : > { %373 = vrot.lane.b32.xlu1 %v497_v7, %s1090_s22 }
  0xe6   : > { %568 = vrot.lane.b32.xlu0 %v1193_v57, %s1089_s21 }
  0xe7   : > { %566 = vrot.lane.b32.xlu1 %v1186_v54, %s1089_s21 }
  0xea   : > { %424 = vrot.lane.b32.xlu0 %v401_v9, %s1091_s23 }
  0xeb   : > { %422 = vrot.lane.b32.xlu1 %v1193_v57, %s1091_s23 }
  0xee   : > { %617 = vrot.lane.b32.xlu0 %v303_v6, %s1094_s28 }
  0xef   : > { %615 = vrot.lane.b32.xlu1 %v302_v5, %s1094_s28 }
  0xf2   : > { %473 = vrot.lane.b32.xlu0 %v450_v10, %s1092_s24 }
  0xf3   : > { %471 = vrot.lane.b32.xlu1 %v303_v6, %s1092_s24 }
  0xf6   : > { %666 = vrot.lane.b32.xlu0 %v352_v8, %s1095_s8 }
  0xf7   : > { %664 = vrot.lane.b32.xlu1 %v497_v7, %s1095_s8 }
  0xfa   : > { %570 = vrot.lane.b32.xlu0 %v401_v9, %s1089_s21 }
  0xfb   : > { %520 = vrot.lane.b32.xlu1 %v352_v8, %s1093_s25 }
  0xfe   : > { %619 = vrot.lane.b32.xlu0 %v450_v10, %s1094_s28 }
  0xff   : > { %522 = vrot.lane.b32.xlu1 %v499_v12, %s1093_s25 }
 0x100   : > { %v411_v15 = vpop.permute.xlu0 %410 }
 0x101   : > { %v315_v14 = vpop.permute.xlu1 %314  ;;  %435 = vst.msk [vmem:[#allocation3] sm:$0xff] %vm434_vm6, %v411_v15 }
 0x102   : > { %338 = vst.msk [vmem:[#allocation3 + $0x8] sm:$0xff] %vm336_vm3, %v315_v14  ;;  %668 = vrot.lane.b32.xlu0 %v499_v12, %s1095_s8 }
 0x103   : > { %621 = vrot.lane.b32.xlu1 %v598_v13, %s1094_s28 }
 0x104   : > { %v460_v18 = vpop.permute.xlu0 %459 }
 0x105   : > { %v364_v17 = vpop.permute.xlu1 %363  ;;  %484 = vst.msk [vmem:[#allocation3] sm:$0xff] %vm483_vm7, %v460_v18 }
 0x106   : > { %387 = vst.msk [vmem:[#allocation3 + $0x8] sm:$0xff] %vm385_vm4, %v364_v17 }
 0x107   : > { %670 = vrot.lane.b32.xlu1 %v647_v16, %s1095_s8 }
 0x108   : > { %v462_v20 = vpop.permute.xlu0 %461 }
 0x109   : > { %v413_v19 = vpop.permute.xlu1 %412 }
 0x10a   : > { %436 = vst.msk [vmem:[#allocation3 + $0x8] sm:$0xff] %vm434_vm6, %v413_v19 }
 0x10b   : > { %485 = vst.msk [vmem:[#allocation3 + $0x8] sm:$0xff] %vm483_vm7, %v462_v20 }
 0x10c   : > { %v319_v22 = vpop.permute.xlu0 %318 }
 0x10d   : > { %v317_v21 = vpop.permute.xlu1 %316  ;;  %340 = vst.msk [vmem:[#allocation3 + $0x18] sm:$0xff] %vm336_vm3, %v319_v22 }
 0x10e   : > { %339 = vst.msk [vmem:[#allocation3 + $0x10] sm:$0xff] %vm336_vm3, %v317_v21 }
 0x110   : > { %v511_v24 = vpop.permute.xlu0 %510 }
 0x111   : > { %v509_v23 = vpop.permute.xlu1 %508  ;;  %534 = vst.msk [vmem:[#allocation3 + $0x8] sm:$0xff] %vm532_vm8, %v511_v24 }
 0x112   : > { %533 = vst.msk [vmem:[#allocation3] sm:$0xff] %vm532_vm8, %v509_v23 }
 0x114   : > { %v368_v26 = vpop.permute.xlu0 %367 }
 0x115   : > { %v366_v25 = vpop.permute.xlu1 %365  ;;  %389 = vst.msk [vmem:[#allocation3 + $0x18] sm:$0xff] %vm385_vm4, %v368_v26 }
 0x116   : > { %388 = vst.msk [vmem:[#allocation3 + $0x10] sm:$0xff] %vm385_vm4, %v366_v25 }
 0x118   : > { %v561_v28 = vpop.permute.xlu0 %560 }
 0x119   : > { %v559_v27 = vpop.permute.xlu1 %558  ;;  %584 = vst.msk [vmem:[#allocation3 + $0x8] sm:$0xff] %vm582_vm9, %v561_v28 }
 0x11a   : > { %583 = vst.msk [vmem:[#allocation3] sm:$0xff] %vm582_vm9, %v559_v27 }
 0x11c   : > { %v417_v30 = vpop.permute.xlu0 %416 }
 0x11d   : > { %v415_v29 = vpop.permute.xlu1 %414  ;;  %438 = vst.msk [vmem:[#allocation3 + $0x18] sm:$0xff] %vm434_vm6, %v417_v30 }
 0x11e   : > { %437 = vst.msk [vmem:[#allocation3 + $0x10] sm:$0xff] %vm434_vm6, %v415_v29 }
 0x120   : > { %v610_v32 = vpop.permute.xlu0 %609 }
 0x121   : > { %v608_v31 = vpop.permute.xlu1 %607  ;;  %633 = vst.msk [vmem:[#allocation3 + $0x8] sm:$0xff] %vm631_vm10, %v610_v32 }
 0x122   : > { %632 = vst.msk [vmem:[#allocation3] sm:$0xff] %vm631_vm10, %v608_v31 }
 0x124   : > { %v321_v34 = vpop.permute.xlu0 %320 }
 0x125   : > { %v464_v33 = vpop.permute.xlu1 %463  ;;  %341 = vst.msk [vmem:[#allocation3 + $0x20] sm:$0xff] %vm336_vm3, %v321_v34 }
 0x126   : > { %486 = vst.msk [vmem:[#allocation3 + $0x10] sm:$0xff] %vm483_vm7, %v464_v33 }
 0x128   : > { %v513_v36 = vpop.permute.xlu0 %512 }
 0x129   : > { %v657_v35 = vpop.permute.xlu1 %656  ;;  %535 = vst.msk [vmem:[#allocation3 + $0x10] sm:$0xff] %vm532_vm8, %v513_v36 }
 0x12a   : > { %681 = vst.msk [vmem:[#allocation3] sm:$0xff] %vm680_vm11, %v657_v35 }
 0x12c   : > { %v323_v38 = vpop.permute.xlu0 %322 }
 0x12d   : > { %v466_v37 = vpop.permute.xlu1 %465  ;;  %342 = vst.msk [vmem:[#allocation3 + $0x28] sm:$0xff] %vm336_vm3, %v323_v38 }
 0x12e   : > { %487 = vst.msk [vmem:[#allocation3 + $0x18] sm:$0xff] %vm483_vm7, %v466_v37 }
 0x130   : > { %v515_v40 = vpop.permute.xlu0 %514 }
 0x131   : > { %v659_v39 = vpop.permute.xlu1 %658  ;;  %v689_v41 = vld [vmem:[#allocation3] sm:$0xff]  ;;  %536 = vst.msk [vmem:[#allocation3 + $0x18] sm:$0xff] %vm532_vm8, %v515_v40 }
 0x132   : > { %682 = vst.msk [vmem:[#allocation3 + $0x8] sm:$0xff] %vm680_vm11, %v659_v39  ;;  %1038 = vmatprep.mubr.msk.f32.mxu0 %vm702_vm12, %v689_v41 }
 0x134   : > { %v372_v43 = vpop.permute.xlu0 %371 }
 0x135   : > { %v370_v42 = vpop.permute.xlu1 %369  ;;  %391 = vst.msk [vmem:[#allocation3 + $0x28] sm:$0xff] %vm385_vm4, %v372_v43 }
 0x136   : > { %390 = vst.msk [vmem:[#allocation3 + $0x20] sm:$0xff] %vm385_vm4, %v370_v42 }
 0x138   : > { %v565_v45 = vpop.permute.xlu0 %564 }
 0x139   : > { %v563_v44 = vpop.permute.xlu1 %562  ;;  %v690_v46 = vld [vmem:[#allocation3 + $0x8] sm:$0xff]  ;;  %586 = vst.msk [vmem:[#allocation3 + $0x18] sm:$0xff] %vm582_vm9, %v565_v45 }
 0x13a   : > { %585 = vst.msk [vmem:[#allocation3 + $0x10] sm:$0xff] %vm582_vm9, %v563_v44  ;;  %1039 = vmatmul.mubr.msk.f32.vlgmr.msra.gmra.mxu0 %vm702_vm12, %v690_v46 }
 0x13c   : > { %v421_v48 = vpop.permute.xlu0 %420 }
 0x13d   : > { %v419_v47 = vpop.permute.xlu1 %418  ;;  %440 = vst.msk [vmem:[#allocation3 + $0x28] sm:$0xff] %vm434_vm6, %v421_v48 }
 0x13e   : > { %439 = vst.msk [vmem:[#allocation3 + $0x20] sm:$0xff] %vm434_vm6, %v419_v47 }
 0x140   : > { %v614_v50 = vpop.permute.xlu0 %613 }
 0x141   : > { %v612_v49 = vpop.permute.xlu1 %611  ;;  %635 = vst.msk [vmem:[#allocation3 + $0x18] sm:$0xff] %vm631_vm10, %v614_v50 }
 0x142   : > { %634 = vst.msk [vmem:[#allocation3 + $0x10] sm:$0xff] %vm631_vm10, %v612_v49 }
 0x144   : > { %v325_v52 = vpop.permute.xlu0 %324 }
 0x145   : > { %v468_v51 = vpop.permute.xlu1 %467  ;;  %343 = vst.msk [vmem:[#allocation3 + $0x30] sm:$0xff] %vm336_vm3, %v325_v52 }
 0x146   : > { %488 = vst.msk [vmem:[#allocation3 + $0x20] sm:$0xff] %vm483_vm7, %v468_v51 }
 0x148   : > { %v517_v54 = vpop.permute.xlu0 %516 }
 0x149   : > { %v661_v53 = vpop.permute.xlu1 %660  ;;  %537 = vst.msk [vmem:[#allocation3 + $0x20] sm:$0xff] %vm532_vm8, %v517_v54 }
 0x14a   : > { %683 = vst.msk [vmem:[#allocation3 + $0x10] sm:$0xff] %vm680_vm11, %v661_v53 }
 0x14c   : > { %v327_v56 = vpop.permute.xlu0 %326 }
 0x14d   : > { %v470_v55 = vpop.permute.xlu1 %469  ;;  %344 = vst.msk [vmem:[#allocation3 + $0x38] sm:$0xff] %vm336_vm3, %v327_v56 }
 0x14e   : > { %489 = vst.msk [vmem:[#allocation3 + $0x28] sm:$0xff] %vm483_vm7, %v470_v55 }
 0x150   : > { %v519_v58 = vpop.permute.xlu0 %518 }
 0x151   : > { %v663_v57 = vpop.permute.xlu1 %662  ;;  %v691_v59 = vld [vmem:[#allocation3 + $0x10] sm:$0xff]  ;;  %538 = vst.msk [vmem:[#allocation3 + $0x28] sm:$0xff] %vm532_vm8, %v519_v58 }
 0x152   : > { %684 = vst.msk [vmem:[#allocation3 + $0x18] sm:$0xff] %vm680_vm11, %v663_v57  ;;  %1041 = vmatprep.mubr.msk.f32.mxu0 %vm702_vm12, %v691_v59 }
 0x154   : > { %v376_v61 = vpop.permute.xlu0 %375 }
 0x155   : > { %v374_v60 = vpop.permute.xlu1 %373  ;;  %393 = vst.msk [vmem:[#allocation3 + $0x38] sm:$0xff] %vm385_vm4, %v376_v61 }
 0x156   : > { %392 = vst.msk [vmem:[#allocation3 + $0x30] sm:$0xff] %vm385_vm4, %v374_v60 }
 0x158   : > { %v569_v63 = vpop.permute.xlu0 %568 }
 0x159   : > { %v567_v62 = vpop.permute.xlu1 %566  ;;  %v692_v0 = vld [vmem:[#allocation3 + $0x18] sm:$0xff]  ;;  %588 = vst.msk [vmem:[#allocation3 + $0x28] sm:$0xff] %vm582_vm9, %v569_v63 }
 0x15a   : > { %587 = vst.msk [vmem:[#allocation3 + $0x20] sm:$0xff] %vm582_vm9, %v567_v62  ;;  %1042 = vmatmul.mubr.msk.f32.gmra.mxu0 %vm702_vm12, %v692_v0 }
 0x15c   : > { %v425_v2 = vpop.permute.xlu0 %424 }
 0x15d   : > { %v423_v1 = vpop.permute.xlu1 %422  ;;  %442 = vst.msk [vmem:[#allocation3 + $0x38] sm:$0xff] %vm434_vm6, %v425_v2 }
 0x15e   : > { %441 = vst.msk [vmem:[#allocation3 + $0x30] sm:$0xff] %vm434_vm6, %v423_v1 }
 0x160   : > { %v618_v4 = vpop.permute.xlu0 %617 }
 0x161   : > { %v616_v3 = vpop.permute.xlu1 %615  ;;  %637 = vst.msk [vmem:[#allocation3 + $0x28] sm:$0xff] %vm631_vm10, %v618_v4 }
 0x162   : > { %636 = vst.msk [vmem:[#allocation3 + $0x20] sm:$0xff] %vm631_vm10, %v616_v3 }
 0x164   : > { %v474_v6 = vpop.permute.xlu0 %473 }
 0x165   : > { %v472_v5 = vpop.permute.xlu1 %471  ;;  %491 = vst.msk [vmem:[#allocation3 + $0x38] sm:$0xff] %vm483_vm7, %v474_v6 }
 0x166   : > { %490 = vst.msk [vmem:[#allocation3 + $0x30] sm:$0xff] %vm483_vm7, %v472_v5 }
 0x168   : > { %v667_v8 = vpop.permute.xlu0 %666 }
 0x169   : > { %v665_v7 = vpop.permute.xlu1 %664  ;;  %686 = vst.msk [vmem:[#allocation3 + $0x28] sm:$0xff] %vm680_vm11, %v667_v8 }
 0x16a   : > { %685 = vst.msk [vmem:[#allocation3 + $0x20] sm:$0xff] %vm680_vm11, %v665_v7 }
 0x16c   : > { %v571_v10 = vpop.permute.xlu0 %570 }
 0x16d   : > { %v521_v9 = vpop.permute.xlu1 %520 }
 0x16e   : > { %539 = vst.msk [vmem:[#allocation3 + $0x30] sm:$0xff] %vm532_vm8, %v521_v9 }
 0x16f   : > { %589 = vst.msk [vmem:[#allocation3 + $0x30] sm:$0xff] %vm582_vm9, %v571_v10 }
 0x170   : > { %v620_v13 = vpop.permute.xlu0 %619  ;;  %v694_v15 = vld [vmem:[#allocation3 + $0x28] sm:$0xff] }
 0x171   : > { %v523_v12 = vpop.permute.xlu1 %522  ;;  %v693_v14 = vld [vmem:[#allocation3 + $0x20] sm:$0xff]  ;;  %638 = vst.msk [vmem:[#allocation3 + $0x30] sm:$0xff] %vm631_vm10, %v620_v13 }
 0x172   : > { %540 = vst.msk [vmem:[#allocation3 + $0x38] sm:$0xff] %vm532_vm8, %v523_v12  ;;  %1044 = vmatprep.mubr.msk.f32.mxu1 %vm702_vm12, %v693_v14 }
 0x173   : > { %590 = vst.msk [vmem:[#allocation3 + $0x38] sm:$0xff] %vm582_vm9, %v1270_v11  ;;  %1045 = vmatmul.mubr.msk.f32.vlgmr.msra.gmra.mxu1 %vm702_vm12, %v694_v15 }
 0x174   : > { %v669_v17 = vpop.permute.xlu0 %668 }
 0x175   : > { %v622_v16 = vpop.permute.xlu1 %621  ;;  %687 = vst.msk [vmem:[#allocation3 + $0x30] sm:$0xff] %vm680_vm11, %v669_v17 }
 0x176   : > { %639 = vst.msk [vmem:[#allocation3 + $0x38] sm:$0xff] %vm631_vm10, %v622_v16 }
 0x179   : > { %v671_v18 = vpop.permute.xlu1 %670 }
 0x17a   : > { %688 = vst.msk [vmem:[#allocation3 + $0x38] sm:$0xff] %vm680_vm11, %v671_v18 }
 0x17c   : > { %v695_v19 = vld [vmem:[#allocation3 + $0x30] sm:$0xff] }
 0x17d   : > { %1047 = vmatprep.mubr.msk.f32.mxu1 %vm702_vm12, %v695_v19 }
 0x181   : > { %v696_v20 = vld [vmem:[#allocation3 + $0x38] sm:$0xff] }
 0x182   : > { %1048 = vmatmul.mubr.msk.f32.gmra.mxu1 %vm702_vm12, %v696_v20 }
 0x1fa   : > { %v1040_v11 = vpop.f32.mrf.mxu0 }
 0x1fb   : > { %838 = vst.msk [vmem:[%s1352_s16 + $0x8] sm:$0xff] %vm836_vm13, %v1040_v11  ;;  %v869_v26 = vmul.f32 %v1040_v11, %v1040_v11  ;;  %v846_v30 = vsel %vm836_vm13, %v1040_v11, 0.0 }
 0x1fc   : > { %v797_v21 = vpop.f32.mrf.mxu0 }
 0x1fd   : > { %837 = vst.msk [vmem:[%s1352_s16] sm:$0xff] %vm836_vm13, %v797_v21  ;;  %v868_v24 = vmul.f32 %v797_v21, %v797_v21  ;;  %v845_v27 = vsel %vm836_vm13, %v797_v21, 0.0  ;;  %v877_v34 = vsel %vm836_vm13, %v869_v26, 0.0 }
 0x1fe   : > { %v847_v33 = vadd.f32 %v846_v30, %v845_v27 }
 0x1ff   : > { %v876_v31 = vsel %vm836_vm13, %v868_v24, 0.0 }
 0x200   : > { %v878_v36 = vadd.f32 %v877_v34, %v876_v31 }
 0x21a   : > { %v1043_v22 = vpop.f32.mrf.mxu0 }
 0x21b   : > { %840 = vst.msk [vmem:[%s1352_s16 + $0x18] sm:$0xff] %vm836_vm13, %v1043_v22  ;;  %v871_v38 = vmul.f32 %v1043_v22, %v1043_v22  ;;  %v850_v41 = vsel %vm836_vm13, %v1043_v22, 0.0 }
 0x21c   : > { %v807_v23 = vpop.f32.mrf.mxu0 }
 0x21d   : > { %839 = vst.msk [vmem:[%s1352_s16 + $0x10] sm:$0xff] %vm836_vm13, %v807_v23  ;;  %v870_v28 = vmul.f32 %v807_v23, %v807_v23  ;;  %v848_v32 = vsel %vm836_vm13, %v807_v23, 0.0  ;;  %v881_v44 = vsel %vm836_vm13, %v871_v38, 0.0 }
 0x21e   : > { %v849_v37 = vadd.f32 %v848_v32, %v847_v33 }
 0x21f   : > { %v879_v35 = vsel %vm836_vm13, %v870_v28, 0.0 }
 0x220   : > { %v880_v40 = vadd.f32 %v879_v35, %v878_v36  ;;  %v851_v43 = vadd.f32 %v850_v41, %v849_v37 }
 0x222   : > { %v882_v46 = vadd.f32 %v881_v44, %v880_v40 }
 0x233   : > { %v1046_v25 = vpop.f32.mrf.mxu1 }
 0x234   : > { %842 = vst.msk [vmem:[%s1352_s16 + $0x28] sm:$0xff] %vm836_vm13, %v1046_v25  ;;  %v873_v48 = vmul.f32 %v1046_v25, %v1046_v25  ;;  %v854_v51 = vsel %vm836_vm13, %v1046_v25, 0.0 }
 0x235   : > { %v817_v29 = vpop.f32.mrf.mxu1 }
 0x236   : > { %841 = vst.msk [vmem:[%s1352_s16 + $0x20] sm:$0xff] %vm836_vm13, %v817_v29  ;;  %v872_v39 = vmul.f32 %v817_v29, %v817_v29  ;;  %v852_v42 = vsel %vm836_vm13, %v817_v29, 0.0  ;;  %v885_v54 = vsel %vm836_vm13, %v873_v48, 0.0 }
 0x237   : > { %v853_v47 = vadd.f32 %v852_v42, %v851_v43 }
 0x238   : > { %v883_v45 = vsel %vm836_vm13, %v872_v39, 0.0 }
 0x239   : > { %v884_v49 = vadd.f32 %v883_v45, %v882_v46  ;;  %v855_v53 = vadd.f32 %v854_v51, %v853_v47 }
 0x23b   : > { %v886_v59 = vadd.f32 %v885_v54, %v884_v49 }
 0x242   : > { %v1049_v50 = vpop.f32.mrf.mxu1 }
 0x243   : > { %844 = vst.msk [vmem:[%s1352_s16 + $0x38] sm:$0xff] %vm836_vm13, %v1049_v50  ;;  %v875_v55 = vmul.f32 %v1049_v50, %v1049_v50  ;;  %v858_v60 = vsel %vm836_vm13, %v1049_v50, 0.0 }
 0x244   : > { %v827_v52 = vpop.f32.mrf.mxu1 }
 0x245   : > { %843 = vst.msk [vmem:[%s1352_s16 + $0x30] sm:$0xff] %vm836_vm13, %v827_v52  ;;  %v856_v56 = vsel %vm836_vm13, %v827_v52, 0.0  ;;  %v874_v57 = vmul.f32 %v827_v52, %v827_v52  ;;  %v889_v0 = vsel %vm836_vm13, %v875_v55, 0.0 }
 0x246   : > { %v857_v58 = vadd.f32 %v856_v56, %v855_v53 }
 0x247   : > { %v887_v61 = vsel %vm836_vm13, %v874_v57, 0.0 }
 0x248   : > { %v859_v62 = vadd.f32 %v858_v60, %v857_v58  ;;  %v888_v63 = vadd.f32 %v887_v61, %v886_v59 }
 0x24a   : > { %v860_v1 = vrot.slane %v859_v62, 4  ;;  %v890_v2 = vadd.f32 %v889_v0, %v888_v63 }
 0x24c   : > { %v861_v3 = vadd.f32 %v860_v1, %v859_v62  ;;  %v891_v4 = vrot.slane %v890_v2, 4 }
 0x24e   : > { %v862_v5 = vrot.slane %v861_v3, 2  ;;  %v892_v6 = vadd.f32 %v891_v4, %v890_v2 }
 0x250   : > { %v863_v7 = vadd.f32 %v862_v5, %v861_v3  ;;  %v893_v8 = vrot.slane %v892_v6, 2 }
 0x252   : > { %v864_v9 = vrot.slane %v863_v7, 1  ;;  %v894_v10 = vadd.f32 %v893_v8, %v892_v6 }
 0x254   : > { %v865_v12 = vadd.f32 %v864_v9, %v863_v7  ;;  %v895_v13 = vrot.slane %v894_v10, 1 }
 0x256   : > { %867 = vst.msk [vmem:[%s181_s20] sm:$0x1] %vm866_vm14, %v865_v12  ;;  %v896_v14 = vadd.f32 %v895_v13, %v894_v10 }
 0x258   : > { %897 = vst.msk [vmem:[%s181_s20 + $0x1] sm:$0x1] %vm866_vm14, %v896_v14 }
 0x259 PF: > { %s14_s12 = sadd.s32 1, %s1084_s12  }
 0x25a   : > { %p11_p4 = scmp.ge.s32.totalorder %s14_s12, 4  }
 0x25c   :  { %13 = sbr.rel (!%p11_p4) target bundleno = 1 (0x1), region = 74 }

</bundles_post_ra>
